<compile_context>
chip_gen: v5e
topology: v5e:2x2
jax: 0.10.0
libtpu: 0.0.40
codegen_flags: <defaults>
</compile_context>

<pallas_src>
import jax
import jax.numpy as jnp
from jax import lax
from jax.experimental import pallas as pl
from jax.experimental.pallas import tpu as pltpu

BN_EPS = 1e-5  # torch.nn.BatchNorm1d default eps


def _round_up(x, m):
    return ((x + m - 1) // m) * m


def make_nfm_kernel(n_fields, n_mlp_layers):
    """Fused NFM kernel for fixed field count / number of MLP layers (BN pre-folded)."""

    def kernel(*refs):
        it = iter(refs)
        emb_ref = next(it)       # (F, TB, E)  raw gathered embedding rows, field-major
        lin_ref = next(it)       # (TB, F)     raw gathered linear-term weights
        xv_ref = next(it)        # (TB, F)     feature values
        fm_scale = next(it)      # (1, E)      folded BatchNorm1d(nemb) scale
        fm_shift = next(it)      # (1, E)      folded BatchNorm1d(nemb) shift
        layer_refs = [(next(it), next(it)) for _ in range(n_mlp_layers)]  # folded (W', b')
        w_out = next(it)         # (1, H)      final Linear weight as a row
        scalars = next(it)       # (1, 2) SMEM: [linear bias, output bias]
        out_ref = next(it)       # (1, 1, TB)  lane-dense output row

        _, tb, e = emb_ref.shape
        xv = xv_ref[...]                                 # (TB, F)

        # ---- FactorizationMachine(reduce_dim=False): 0.5*((sum x)^2 - sum x^2)
        # Per-field accumulation keeps everything on aligned (TB, E) tiles; the
        # value scaling (Embedding0: emb[id] * value) is fused here.
        s = jnp.zeros((tb, e), jnp.float32)
        sq = jnp.zeros((tb, e), jnp.float32)
        for f in range(n_fields):                        # static, unrolled (F small)
            xf = emb_ref[f] * xv[:, f:f + 1]             # (TB, E)
            s = s + xf
            sq = sq + xf * xf
        h = 0.5 * (s * s - sq)                           # (TB, E)

        # ---- BatchNorm1d(nemb) (eval) folded to a single FMA; Dropout = identity.
        h = h * fm_scale[...] + fm_shift[...]
        # TODO(synk): Dropout layers are inference-mode identity (no RNG masking).

        # ---- MLP hidden layers: (Linear with folded BN) -> ReLU -> (Dropout)
        for (W, b) in layer_refs:
            h = jnp.dot(h, W[...], preferred_element_type=jnp.float32) + b[...]
            h = jnp.maximum(h, 0.0)

        # ---- final Linear(nhid, 1): VPU multiply + lane reduce (skip N=1 MXU pass)
        y_mlp = jnp.sum(h * w_out[...], axis=-1, keepdims=True)         # (TB, 1)

        # ---- Linear(nfeat) sparse term: sum_f w[id_f] * value_f
        lin = jnp.sum(lin_ref[...] * xv, axis=-1, keepdims=True)        # (TB, 1)

        y = y_mlp + lin + (scalars[0, 0] + scalars[0, 1])                # (TB, 1)
        out_ref[0, 0, :] = y[:, 0]                                       # lane-dense store

    return kernel


def prepare_folded_params(params):
    """Fold eval-mode BatchNorms into scale/shift (FM) and into Linear W/b (MLP)."""
    fm_scale = params["fm_gamma"] * lax.rsqrt(params["fm_var"] + BN_EPS)   # (1, E)
    fm_shift = params["fm_beta"] - params["fm_mean"] * fm_scale            # (1, E)

    folded_layers = []
    for (W, b, g, be, m, v) in params["mlp_layers"]:
        s = g * lax.rsqrt(v + BN_EPS)            # (1, H)
        Wf = W * s                               # (in, H)
        bf = (b - m) * s + be                    # (1, H)
        folded_layers.append((Wf, bf))

    w_out_row = params["w_out"].T                # (1, H)
    scalars = jnp.concatenate(
        [params["lin_bias"].reshape(1, 1), params["b_out"].reshape(1, 1)], axis=1
    ).astype(jnp.float32)                        # (1, 2)
    return fm_scale, fm_shift, folded_layers, w_out_row, scalars


def nfm_pallas_forward(x_id, x_value, params, *, max_batch_tile=512):
    """Full NFM forward: sparse gather in JAX glue, everything else fused in Pallas."""
    B, F = x_id.shape
    E = params["emb_table"].shape[1]
    n_layers = len(params["mlp_layers"])

    # batch tile: multiple of 128 (fills sublanes/lanes), capped at max_batch_tile
    TB = max_batch_tile if B >= max_batch_tile else _round_up(B, 128)
    B_pad = _round_up(B, TB)
    n_tiles = B_pad // TB

    # pad the (small) id/value tensors before the gather (zero value => zero contrib)
    if B_pad != B:
        pad = B_pad - B
        x_id = jnp.pad(x_id, ((0, pad), (0, 0)))
        x_value = jnp.pad(x_value, ((0, pad), (0, 0)))

    # --- glue: sparse row gathers only (value scaling happens inside the kernel).
    # Field-major gather (indices transposed) so no extra transpose pass is needed.
    # TODO(synk): the gather itself could be fused via scalar-prefetch + manual DMA,
    #             but at E=32 per-row DMAs are descriptor-bound; left in XLA glue.
    emb_rows = params["emb_table"][x_id.T]               # (F, B_pad, E)
    lin_rows = params["lin_w"][x_id][..., 0]             # (B_pad, F)
    x_value = x_value.astype(jnp.float32)

    fm_scale, fm_shift, folded_layers, w_out_row, scalars = prepare_folded_params(params)

    const2 = lambda i: (0, 0)
    in_specs = [
        pl.BlockSpec((F, TB, E), lambda i: (0, i, 0)),   # streamed per batch tile
        pl.BlockSpec((TB, F), lambda i: (i, 0)),
        pl.BlockSpec((TB, F), lambda i: (i, 0)),
        pl.BlockSpec((1, E), const2),                    # resident params below
        pl.BlockSpec((1, E), const2),
    ]
    inputs = [emb_rows, lin_rows, x_value, fm_scale, fm_shift]
    for (Wf, bf) in folded_layers:
        in_specs.append(pl.BlockSpec(Wf.shape, const2))
        in_specs.append(pl.BlockSpec(bf.shape, const2))
        inputs.extend([Wf, bf])
    in_specs.append(pl.BlockSpec(w_out_row.shape, const2))
    inputs.append(w_out_row)
    in_specs.append(pl.BlockSpec((1, 2), const2, memory_space=pltpu.MemorySpace.SMEM))
    inputs.append(scalars)

    out = pl.pallas_call(
        make_nfm_kernel(F, n_layers),
        out_shape=jax.ShapeDtypeStruct((n_tiles, 1, TB), jnp.float32),
        grid=(n_tiles,),
        in_specs=in_specs,
        out_specs=pl.BlockSpec((1, 1, TB), lambda i: (i, 0, 0)),
        compiler_params=pltpu.CompilerParams(
            dimension_semantics=("parallel",),
            vmem_limit_bytes=64 * 1024 * 1024,
        ),
    )(*inputs)

    return out.reshape(B_pad)[:B]   # size-B vector, matching torch forward return


def nfm_reference(x_id, x_value, params):
    """Pure-JAX reference of the same (inference-mode) forward, from raw params."""
    emb = params["emb_table"][x_id] * x_value[..., None]
    s = jnp.sum(emb, axis=1)
    sq = jnp.sum(emb * emb, axis=1)
    h = 0.5 * (s * s - sq)
    h = (h - params["fm_mean"]) / jnp.sqrt(params["fm_var"] + BN_EPS) * params["fm_gamma"] + params["fm_beta"]
    for (W, b, g, be, m, v) in params["mlp_layers"]:
        h = h @ W + b
        h = (h - m) / jnp.sqrt(v + BN_EPS) * g + be
        h = jnp.maximum(h, 0.0)
    y_mlp = (h @ params["w_out"] + params["b_out"])[:, 0]
    lin = jnp.sum(params["lin_w"][x_id][..., 0] * x_value, axis=1) + params["lin_bias"][0, 0]
    return lin + y_mlp


def init_params(key, nfeat, nemb, mlp_nlayers, mlp_hid):
    keys = jax.random.split(key, 4 + 2 * mlp_nlayers)
    params = {
        "emb_table": (jax.random.normal(keys[0], (nfeat, nemb), jnp.float32) * 0.1),
        "lin_w": (jax.random.normal(keys[1], (nfeat, 1), jnp.float32) * 0.1),
        "lin_bias": jnp.zeros((1, 1), jnp.float32),
        # BatchNorm1d(nemb): fresh (untrained) running stats
        "fm_gamma": jnp.ones((1, nemb), jnp.float32),
        "fm_beta": jnp.zeros((1, nemb), jnp.float32),
        "fm_mean": jnp.zeros((1, nemb), jnp.float32),
        "fm_var": jnp.ones((1, nemb), jnp.float32),
    }
    layers = []
    in_dim = nemb
    for i in range(mlp_nlayers):
        W = jax.random.normal(keys[2 + 2 * i], (in_dim, mlp_hid), jnp.float32) * 0.1
        b = jax.random.normal(keys[3 + 2 * i], (1, mlp_hid), jnp.float32) * 0.01
        g = jnp.ones((1, mlp_hid), jnp.float32)
        be = jnp.zeros((1, mlp_hid), jnp.float32)
        m = jnp.zeros((1, mlp_hid), jnp.float32)
        v = jnp.ones((1, mlp_hid), jnp.float32)
        layers.append((W, b, g, be, m, v))
        in_dim = mlp_hid
    params["mlp_layers"] = layers
    params["w_out"] = jax.random.normal(keys[-2], (in_dim, 1), jnp.float32) * 0.1
    params["b_out"] = jax.random.normal(keys[-1], (1, 1), jnp.float32) * 0.01
    return params


if __name__ == "__main__":
    # Small, deterministic configuration
    B, F = 8, 10           # batch, number of sparse fields per example
    NFEAT = 100            # vocabulary of feature ids
    NEMB = 32              # embedding dim
    MLP_LAYERS = 2
    MLP_HID = 32
    DROPOUT = 0.0          # inference-mode anyway

    key = jax.random.PRNGKey(0)
    k_id, k_val, k_param = jax.random.split(key, 3)
    x_id = jax.random.randint(k_id, (B, F), 0, NFEAT, dtype=jnp.int32)
    x_value = jax.random.uniform(k_val, (B, F), jnp.float32)

    params = init_params(k_param, NFEAT, NEMB, MLP_LAYERS, MLP_HID)

    y = nfm_pallas_forward(x_id, x_value, params)
    y = jax.block_until_ready(y)

    y_ref = nfm_reference(x_id, x_value, params)
    assert y.shape == (B,)
    assert jnp.allclose(y, y_ref, rtol=1e-4, atol=1e-4), (y, y_ref)

    print("KERNEL_OK")
</pallas_src>

<mosaic_0001>
module attributes {stable_mosaic.version = 11 : i64} {
  func.func @kernel(%arg0: i32, %arg1: memref<10x128x32xf32, #tpu.memory_space<vmem>>, %arg2: memref<128x10xf32, #tpu.memory_space<vmem>>, %arg3: memref<128x10xf32, #tpu.memory_space<vmem>>, %arg4: memref<1x32xf32, #tpu.memory_space<vmem>>, %arg5: memref<1x32xf32, #tpu.memory_space<vmem>>, %arg6: memref<32x32xf32, #tpu.memory_space<vmem>>, %arg7: memref<1x32xf32, #tpu.memory_space<vmem>>, %arg8: memref<32x32xf32, #tpu.memory_space<vmem>>, %arg9: memref<1x32xf32, #tpu.memory_space<vmem>>, %arg10: memref<1x32xf32, #tpu.memory_space<vmem>>, %arg11: memref<1x2xf32, #tpu.memory_space<smem>>, %arg12: memref<1x1x128xf32, #tpu.memory_space<vmem>>) attributes {dimension_semantics = [#tpu.dimension_semantics<parallel>], iteration_bounds = array<i64: 1>, scalar_prefetch = 0 : i64, scratch_operands = 0 : i64, tpu.core_type = #tpu.core_type<tc>, window_params = [{transform_indices = @transform_0, window_bounds = array<i64: 10, 128, 32>}, {transform_indices = @transform_1, window_bounds = array<i64: 128, 10>}, {transform_indices = @transform_2, window_bounds = array<i64: 128, 10>}, {pipeline_mode = #tpu.pipeline_mode<synchronous>, transform_indices = @transform_3, window_bounds = array<i64: 1, 32>}, {pipeline_mode = #tpu.pipeline_mode<synchronous>, transform_indices = @transform_4, window_bounds = array<i64: 1, 32>}, {pipeline_mode = #tpu.pipeline_mode<synchronous>, transform_indices = @transform_5, window_bounds = array<i64: 32, 32>}, {pipeline_mode = #tpu.pipeline_mode<synchronous>, transform_indices = @transform_6, window_bounds = array<i64: 1, 32>}, {pipeline_mode = #tpu.pipeline_mode<synchronous>, transform_indices = @transform_7, window_bounds = array<i64: 32, 32>}, {pipeline_mode = #tpu.pipeline_mode<synchronous>, transform_indices = @transform_8, window_bounds = array<i64: 1, 32>}, {pipeline_mode = #tpu.pipeline_mode<synchronous>, transform_indices = @transform_9, window_bounds = array<i64: 1, 32>}, {transform_indices = @transform_10, window_bounds = array<i64: 1, 2>}, {transform_indices = @transform_11, window_bounds = array<i64: 1, 1, 128>}]} {
    %c0 = arith.constant 0 : index
    %c0_0 = arith.constant 0 : index
    %0 = vector.load %arg3[%c0, %c0_0] : memref<128x10xf32, #tpu.memory_space<vmem>>, vector<128x10xf32>
    %cst = arith.constant 0.000000e+00 : f32
    %1 = vector.broadcast %cst : f32 to vector<128x32xf32>
    %cst_1 = arith.constant 0.000000e+00 : f32
    %2 = vector.broadcast %cst_1 : f32 to vector<128x32xf32>
    %c0_2 = arith.constant 0 : index
    %c0_3 = arith.constant 0 : index
    %c0_4 = arith.constant 0 : index
    %3 = vector.load %arg1[%c0_2, %c0_3, %c0_4] : memref<10x128x32xf32, #tpu.memory_space<vmem>>, vector<1x128x32xf32>
    %4 = vector.shape_cast %3 : vector<1x128x32xf32> to vector<128x32xf32>
    %5 = vector.extract_strided_slice %0 {offsets = [0, 0], sizes = [128, 1], strides = [1, 1]} : vector<128x10xf32> to vector<128x1xf32>
    %6 = vector.broadcast %5 : vector<128x1xf32> to vector<128x32xf32>
    %7 = arith.mulf %4, %6 : vector<128x32xf32>
    %8 = arith.addf %1, %7 : vector<128x32xf32>
    %9 = arith.mulf %7, %7 : vector<128x32xf32>
    %10 = arith.addf %2, %9 : vector<128x32xf32>
    %c1 = arith.constant 1 : index
    %c0_5 = arith.constant 0 : index
    %c0_6 = arith.constant 0 : index
    %11 = vector.load %arg1[%c1, %c0_5, %c0_6] : memref<10x128x32xf32, #tpu.memory_space<vmem>>, vector<1x128x32xf32>
    %12 = vector.shape_cast %11 : vector<1x128x32xf32> to vector<128x32xf32>
    %13 = vector.extract_strided_slice %0 {offsets = [0, 1], sizes = [128, 1], strides = [1, 1]} : vector<128x10xf32> to vector<128x1xf32>
    %14 = vector.broadcast %13 : vector<128x1xf32> to vector<128x32xf32>
    %15 = arith.mulf %12, %14 : vector<128x32xf32>
    %16 = arith.addf %8, %15 : vector<128x32xf32>
    %17 = arith.mulf %15, %15 : vector<128x32xf32>
    %18 = arith.addf %10, %17 : vector<128x32xf32>
    %c2 = arith.constant 2 : index
    %c0_7 = arith.constant 0 : index
    %c0_8 = arith.constant 0 : index
    %19 = vector.load %arg1[%c2, %c0_7, %c0_8] : memref<10x128x32xf32, #tpu.memory_space<vmem>>, vector<1x128x32xf32>
    %20 = vector.shape_cast %19 : vector<1x128x32xf32> to vector<128x32xf32>
    %21 = vector.extract_strided_slice %0 {offsets = [0, 2], sizes = [128, 1], strides = [1, 1]} : vector<128x10xf32> to vector<128x1xf32>
    %22 = vector.broadcast %21 : vector<128x1xf32> to vector<128x32xf32>
    %23 = arith.mulf %20, %22 : vector<128x32xf32>
    %24 = arith.addf %16, %23 : vector<128x32xf32>
    %25 = arith.mulf %23, %23 : vector<128x32xf32>
    %26 = arith.addf %18, %25 : vector<128x32xf32>
    %c3 = arith.constant 3 : index
    %c0_9 = arith.constant 0 : index
    %c0_10 = arith.constant 0 : index
    %27 = vector.load %arg1[%c3, %c0_9, %c0_10] : memref<10x128x32xf32, #tpu.memory_space<vmem>>, vector<1x128x32xf32>
    %28 = vector.shape_cast %27 : vector<1x128x32xf32> to vector<128x32xf32>
    %29 = vector.extract_strided_slice %0 {offsets = [0, 3], sizes = [128, 1], strides = [1, 1]} : vector<128x10xf32> to vector<128x1xf32>
    %30 = vector.broadcast %29 : vector<128x1xf32> to vector<128x32xf32>
    %31 = arith.mulf %28, %30 : vector<128x32xf32>
    %32 = arith.addf %24, %31 : vector<128x32xf32>
    %33 = arith.mulf %31, %31 : vector<128x32xf32>
    %34 = arith.addf %26, %33 : vector<128x32xf32>
    %c4 = arith.constant 4 : index
    %c0_11 = arith.constant 0 : index
    %c0_12 = arith.constant 0 : index
    %35 = vector.load %arg1[%c4, %c0_11, %c0_12] : memref<10x128x32xf32, #tpu.memory_space<vmem>>, vector<1x128x32xf32>
    %36 = vector.shape_cast %35 : vector<1x128x32xf32> to vector<128x32xf32>
    %37 = vector.extract_strided_slice %0 {offsets = [0, 4], sizes = [128, 1], strides = [1, 1]} : vector<128x10xf32> to vector<128x1xf32>
    %38 = vector.broadcast %37 : vector<128x1xf32> to vector<128x32xf32>
    %39 = arith.mulf %36, %38 : vector<128x32xf32>
    %40 = arith.addf %32, %39 : vector<128x32xf32>
    %41 = arith.mulf %39, %39 : vector<128x32xf32>
    %42 = arith.addf %34, %41 : vector<128x32xf32>
    %c5 = arith.constant 5 : index
    %c0_13 = arith.constant 0 : index
    %c0_14 = arith.constant 0 : index
    %43 = vector.load %arg1[%c5, %c0_13, %c0_14] : memref<10x128x32xf32, #tpu.memory_space<vmem>>, vector<1x128x32xf32>
    %44 = vector.shape_cast %43 : vector<1x128x32xf32> to vector<128x32xf32>
    %45 = vector.extract_strided_slice %0 {offsets = [0, 5], sizes = [128, 1], strides = [1, 1]} : vector<128x10xf32> to vector<128x1xf32>
    %46 = vector.broadcast %45 : vector<128x1xf32> to vector<128x32xf32>
    %47 = arith.mulf %44, %46 : vector<128x32xf32>
    %48 = arith.addf %40, %47 : vector<128x32xf32>
    %49 = arith.mulf %47, %47 : vector<128x32xf32>
    %50 = arith.addf %42, %49 : vector<128x32xf32>
    %c6 = arith.constant 6 : index
    %c0_15 = arith.constant 0 : index
    %c0_16 = arith.constant 0 : index
    %51 = vector.load %arg1[%c6, %c0_15, %c0_16] : memref<10x128x32xf32, #tpu.memory_space<vmem>>, vector<1x128x32xf32>
    %52 = vector.shape_cast %51 : vector<1x128x32xf32> to vector<128x32xf32>
    %53 = vector.extract_strided_slice %0 {offsets = [0, 6], sizes = [128, 1], strides = [1, 1]} : vector<128x10xf32> to vector<128x1xf32>
    %54 = vector.broadcast %53 : vector<128x1xf32> to vector<128x32xf32>
    %55 = arith.mulf %52, %54 : vector<128x32xf32>
    %56 = arith.addf %48, %55 : vector<128x32xf32>
    %57 = arith.mulf %55, %55 : vector<128x32xf32>
    %58 = arith.addf %50, %57 : vector<128x32xf32>
    %c7 = arith.constant 7 : index
    %c0_17 = arith.constant 0 : index
    %c0_18 = arith.constant 0 : index
    %59 = vector.load %arg1[%c7, %c0_17, %c0_18] : memref<10x128x32xf32, #tpu.memory_space<vmem>>, vector<1x128x32xf32>
    %60 = vector.shape_cast %59 : vector<1x128x32xf32> to vector<128x32xf32>
    %61 = vector.extract_strided_slice %0 {offsets = [0, 7], sizes = [128, 1], strides = [1, 1]} : vector<128x10xf32> to vector<128x1xf32>
    %62 = vector.broadcast %61 : vector<128x1xf32> to vector<128x32xf32>
    %63 = arith.mulf %60, %62 : vector<128x32xf32>
    %64 = arith.addf %56, %63 : vector<128x32xf32>
    %65 = arith.mulf %63, %63 : vector<128x32xf32>
    %66 = arith.addf %58, %65 : vector<128x32xf32>
    %c8 = arith.constant 8 : index
    %c0_19 = arith.constant 0 : index
    %c0_20 = arith.constant 0 : index
    %67 = vector.load %arg1[%c8, %c0_19, %c0_20] : memref<10x128x32xf32, #tpu.memory_space<vmem>>, vector<1x128x32xf32>
    %68 = vector.shape_cast %67 : vector<1x128x32xf32> to vector<128x32xf32>
    %69 = vector.extract_strided_slice %0 {offsets = [0, 8], sizes = [128, 1], strides = [1, 1]} : vector<128x10xf32> to vector<128x1xf32>
    %70 = vector.broadcast %69 : vector<128x1xf32> to vector<128x32xf32>
    %71 = arith.mulf %68, %70 : vector<128x32xf32>
    %72 = arith.addf %64, %71 : vector<128x32xf32>
    %73 = arith.mulf %71, %71 : vector<128x32xf32>
    %74 = arith.addf %66, %73 : vector<128x32xf32>
    %c9 = arith.constant 9 : index
    %c0_21 = arith.constant 0 : index
    %c0_22 = arith.constant 0 : index
    %75 = vector.load %arg1[%c9, %c0_21, %c0_22] : memref<10x128x32xf32, #tpu.memory_space<vmem>>, vector<1x128x32xf32>
    %76 = vector.shape_cast %75 : vector<1x128x32xf32> to vector<128x32xf32>
    %77 = vector.extract_strided_slice %0 {offsets = [0, 9], sizes = [128, 1], strides = [1, 1]} : vector<128x10xf32> to vector<128x1xf32>
    %78 = vector.broadcast %77 : vector<128x1xf32> to vector<128x32xf32>
    %79 = arith.mulf %76, %78 : vector<128x32xf32>
    %80 = arith.addf %72, %79 : vector<128x32xf32>
    %81 = arith.mulf %79, %79 : vector<128x32xf32>
    %82 = arith.addf %74, %81 : vector<128x32xf32>
    %83 = arith.mulf %80, %80 : vector<128x32xf32>
    %84 = arith.subf %83, %82 : vector<128x32xf32>
    %cst_23 = arith.constant 5.000000e-01 : f32
    %85 = vector.broadcast %cst_23 : f32 to vector<128x32xf32>
    %86 = arith.mulf %85, %84 : vector<128x32xf32>
    %c0_24 = arith.constant 0 : index
    %c0_25 = arith.constant 0 : index
    %87 = vector.load %arg4[%c0_24, %c0_25] : memref<1x32xf32, #tpu.memory_space<vmem>>, vector<1x32xf32>
    %88 = vector.broadcast %87 : vector<1x32xf32> to vector<128x32xf32>
    %89 = arith.mulf %86, %88 : vector<128x32xf32>
    %c0_26 = arith.constant 0 : index
    %c0_27 = arith.constant 0 : index
    %90 = vector.load %arg5[%c0_26, %c0_27] : memref<1x32xf32, #tpu.memory_space<vmem>>, vector<1x32xf32>
    %91 = vector.broadcast %90 : vector<1x32xf32> to vector<128x32xf32>
    %92 = arith.addf %89, %91 : vector<128x32xf32>
    %c0_28 = arith.constant 0 : index
    %c0_29 = arith.constant 0 : index
    %93 = vector.load %arg6[%c0_28, %c0_29] : memref<32x32xf32, #tpu.memory_space<vmem>>, vector<32x32xf32>
    %cst_30 = arith.constant dense<0.000000e+00> : vector<128x32xf32>
    %94 = tpu.matmul %92, %93, %cst_30 {dimension_numbers = #tpu.dot_dimension_numbers<[1], [0], [0], [1], [0, 0, 1, 1], [], []>} : vector<128x32xf32>, vector<32x32xf32>, vector<128x32xf32> -> vector<128x32xf32>
    %c0_31 = arith.constant 0 : index
    %c0_32 = arith.constant 0 : index
    %95 = vector.load %arg7[%c0_31, %c0_32] : memref<1x32xf32, #tpu.memory_space<vmem>>, vector<1x32xf32>
    %96 = vector.broadcast %95 : vector<1x32xf32> to vector<128x32xf32>
    %97 = arith.addf %94, %96 : vector<128x32xf32>
    %cst_33 = arith.constant 0.000000e+00 : f32
    %98 = vector.broadcast %cst_33 : f32 to vector<128x32xf32>
    %99 = arith.maximumf %97, %98 : vector<128x32xf32>
    %c0_34 = arith.constant 0 : index
    %c0_35 = arith.constant 0 : index
    %100 = vector.load %arg8[%c0_34, %c0_35] : memref<32x32xf32, #tpu.memory_space<vmem>>, vector<32x32xf32>
    %cst_36 = arith.constant dense<0.000000e+00> : vector<128x32xf32>
    %101 = tpu.matmul %99, %100, %cst_36 {dimension_numbers = #tpu.dot_dimension_numbers<[1], [0], [0], [1], [0, 0, 1, 1], [], []>} : vector<128x32xf32>, vector<32x32xf32>, vector<128x32xf32> -> vector<128x32xf32>
    %c0_37 = arith.constant 0 : index
    %c0_38 = arith.constant 0 : index
    %102 = vector.load %arg9[%c0_37, %c0_38] : memref<1x32xf32, #tpu.memory_space<vmem>>, vector<1x32xf32>
    %103 = vector.broadcast %102 : vector<1x32xf32> to vector<128x32xf32>
    %104 = arith.addf %101, %103 : vector<128x32xf32>
    %cst_39 = arith.constant 0.000000e+00 : f32
    %105 = vector.broadcast %cst_39 : f32 to vector<128x32xf32>
    %106 = arith.maximumf %104, %105 : vector<128x32xf32>
    %c0_40 = arith.constant 0 : index
    %c0_41 = arith.constant 0 : index
    %107 = vector.load %arg10[%c0_40, %c0_41] : memref<1x32xf32, #tpu.memory_space<vmem>>, vector<1x32xf32>
    %108 = vector.broadcast %107 : vector<1x32xf32> to vector<128x32xf32>
    %109 = arith.mulf %106, %108 : vector<128x32xf32>
    %cst_42 = arith.constant dense<0.000000e+00> : vector<128xf32>
    %110 = vector.multi_reduction <add>, %109, %cst_42 [1] : vector<128x32xf32> to vector<128xf32>
    %111 = vector.shape_cast %110 : vector<128xf32> to vector<128x1xf32>
    %c0_43 = arith.constant 0 : index
    %c0_44 = arith.constant 0 : index
    %112 = vector.load %arg2[%c0_43, %c0_44] : memref<128x10xf32, #tpu.memory_space<vmem>>, vector<128x10xf32>
    %113 = arith.mulf %112, %0 : vector<128x10xf32>
    %cst_45 = arith.constant dense<0.000000e+00> : vector<128xf32>
    %114 = vector.multi_reduction <add>, %113, %cst_45 [1] : vector<128x10xf32> to vector<128xf32>
    %115 = vector.shape_cast %114 : vector<128xf32> to vector<128x1xf32>
    %116 = arith.addf %111, %115 : vector<128x1xf32>
    %c0_46 = arith.constant 0 : index
    %c0_47 = arith.constant 0 : index
    %117 = memref.load %arg11[%c0_46, %c0_47] : memref<1x2xf32, #tpu.memory_space<smem>>
    %c0_48 = arith.constant 0 : index
    %c1_49 = arith.constant 1 : index
    %118 = memref.load %arg11[%c0_48, %c1_49] : memref<1x2xf32, #tpu.memory_space<smem>>
    %119 = arith.addf %117, %118 : f32
    %120 = vector.broadcast %119 : f32 to vector<128x1xf32>
    %121 = arith.addf %116, %120 : vector<128x1xf32>
    %122 = vector.shape_cast %121 : vector<128x1xf32> to vector<128xf32>
    %c0_50 = arith.constant 0 : index
    %c0_51 = arith.constant 0 : index
    %c0_52 = arith.constant 0 : index
    %123 = vector.load %arg12[%c0_50, %c0_51, %c0_52] : memref<1x1x128xf32, #tpu.memory_space<vmem>>, vector<1x1x128xf32>
    %124 = vector.shape_cast %123 : vector<1x1x128xf32> to vector<128xf32>
    %125 = vector.shape_cast %122 : vector<128xf32> to vector<1x1x128xf32>
    tpu.vector_store %arg12[%c0_50, %c0_51, %c0_52], %125 {strides = array<i32>} : memref<1x1x128xf32, #tpu.memory_space<vmem>>, vector<1x1x128xf32>,
    return
  }
  func.func @transform_0(%arg0: i32) -> (i32, i32, i32) {
    %c0_i32 = arith.constant 0 : i32
    %c0_i32_0 = arith.constant 0 : i32
    %c0_i32_1 = arith.constant 0 : i32
    return %c0_i32, %arg0, %c0_i32_0 : i32, i32, i32
  }
  func.func @transform_1(%arg0: i32) -> (i32, i32) {
    %c0_i32 = arith.constant 0 : i32
    %c0_i32_0 = arith.constant 0 : i32
    return %arg0, %c0_i32 : i32, i32
  }
  func.func @transform_2(%arg0: i32) -> (i32, i32) {
    %c0_i32 = arith.constant 0 : i32
    %c0_i32_0 = arith.constant 0 : i32
    return %arg0, %c0_i32 : i32, i32
  }
  func.func @transform_3(%arg0: i32) -> (i32, i32) {
    %c0_i32 = arith.constant 0 : i32
    %c0_i32_0 = arith.constant 0 : i32
    %c0_i32_1 = arith.constant 0 : i32
    return %c0_i32, %c0_i32_0 : i32, i32
  }
  func.func @transform_4(%arg0: i32) -> (i32, i32) {
    %c0_i32 = arith.constant 0 : i32
    %c0_i32_0 = arith.constant 0 : i32
    %c0_i32_1 = arith.constant 0 : i32
    return %c0_i32, %c0_i32_0 : i32, i32
  }
  func.func @transform_5(%arg0: i32) -> (i32, i32) {
    %c0_i32 = arith.constant 0 : i32
    %c0_i32_0 = arith.constant 0 : i32
    %c0_i32_1 = arith.constant 0 : i32
    return %c0_i32, %c0_i32_0 : i32, i32
  }
  func.func @transform_6(%arg0: i32) -> (i32, i32) {
    %c0_i32 = arith.constant 0 : i32
    %c0_i32_0 = arith.constant 0 : i32
    %c0_i32_1 = arith.constant 0 : i32
    return %c0_i32, %c0_i32_0 : i32, i32
  }
  func.func @transform_7(%arg0: i32) -> (i32, i32) {
    %c0_i32 = arith.constant 0 : i32
    %c0_i32_0 = arith.constant 0 : i32
    %c0_i32_1 = arith.constant 0 : i32
    return %c0_i32, %c0_i32_0 : i32, i32
  }
  func.func @transform_8(%arg0: i32) -> (i32, i32) {
    %c0_i32 = arith.constant 0 : i32
    %c0_i32_0 = arith.constant 0 : i32
    %c0_i32_1 = arith.constant 0 : i32
    return %c0_i32, %c0_i32_0 : i32, i32
  }
  func.func @transform_9(%arg0: i32) -> (i32, i32) {
    %c0_i32 = arith.constant 0 : i32
    %c0_i32_0 = arith.constant 0 : i32
    %c0_i32_1 = arith.constant 0 : i32
    return %c0_i32, %c0_i32_0 : i32, i32
  }
  func.func @transform_10(%arg0: i32) -> (i32, i32) {
    %c0_i32 = arith.constant 0 : i32
    %c0_i32_0 = arith.constant 0 : i32
    %c0_i32_1 = arith.constant 0 : i32
    return %c0_i32, %c0_i32_0 : i32, i32
  }
  func.func @transform_11(%arg0: i32) -> (i32, i32, i32) {
    %c0_i32 = arith.constant 0 : i32
    %c0_i32_0 = arith.constant 0 : i32
    %c0_i32_1 = arith.constant 0 : i32
    return %arg0, %c0_i32, %c0_i32_0 : i32, i32, i32
  }
}

</mosaic_0001>

<bundles_post_ra>
// kernel: tpu_custom_call.1
= control target key start
LH: loop header
LB: loop body
LE: loop exit
PB: predicated region body
PF: predicated region fallthrough
CT: control target
= control target key end

     0   :  { %16 = vsyncpa [#allocation4], 0  ;;  %s4250_s0 = inlined_call_operand.vmem [shape: f32[10,128,32], index: 0, kind: input, shape index: {}]   ;;  %s4251_s1 = inlined_call_operand.vmem [shape: f32[128,10], index: 1, kind: input, shape index: {}]   ;;  %s4252_s2 = inlined_call_operand.vmem [shape: f32[128,10], index: 2, kind: input, shape index: {}]   ;;  %s4253_s3 = inlined_call_operand.vmem [shape: f32[1,32], index: 3, kind: input, shape index: {}]   ;;  %s4254_s4 = inlined_call_operand.vmem [shape: f32[1,32], index: 4, kind: input, shape index: {}]   ;;  %s4255_s5 = inlined_call_operand.vmem [shape: f32[32,32], index: 5, kind: input, shape index: {}]   ;;  %s4256_s6 = inlined_call_operand.vmem [shape: f32[1,32], index: 6, kind: input, shape index: {}]   ;;  %s4257_s7 = inlined_call_operand.vmem [shape: f32[32,32], index: 7, kind: input, shape index: {}]   ;;  %s4258_s8 = inlined_call_operand.vmem [shape: f32[1,32], index: 8, kind: input, shape index: {}]   ;;  %s4259_s9 = inlined_call_operand.vmem [shape: f32[1,32], index: 9, kind: input, shape index: {}]   ;;  %s4260_s10 = inlined_call_operand.vmem [shape: f32[1,2], index: 10, kind: input, shape index: {}]   ;;  %s4261_s11 = inlined_call_operand.hbm [shape: f32[1,1,128], index: 11, kind: output, shape index: {}]  }
   0x1   :  { %17 = vsyncpa [#allocation3], 0  ;;  %s43_s19 = sshll.u32 %s4260_s10, 4  ;;  %s2514_s20 = smov [#allocation2]   ;;  %s44_s19 = int_to_ptr.vmem [resolvable:$true] %s43_s19 }
   0x2   :  { %46 = dma.vmem_to_smem %s44_s19, 16, %s2514_s20, [#allocation4]  }
   0x3   :  { %2510 = dma.done.wait [#allocation4], 16  }
   0x4   :  { %2511 = vsyncadd [#allocation4], 4294967280 }
   0x5   :  { %51 = sfence }
   0x6   :  { %v2592_v0 = vld [vmem:[%s4252_s2 + $0x20] sm:$0xff]  ;;  %v2597_v1 = vld [vmem:[%s4252_s2 + $0x10] sm:$0xff]  ;;  %v2515_v3 = vmov 0   ;;  %v2610_v4 = vld [vmem:[%s4252_s2 + $0x28] sm:$0xff]  ;;  %v2516_v17 = vmov 1   ;;  %v2517_v18 = vmov 2  }
   0x7   :  { %4278 = vst [vmem:[#allocation8_spill] sm:$0xff] %v2592_v0  ;;  %v2602_v2 = vld [vmem:[%s4252_s2] sm:$0xff]  ;;  %2378 = vset.pattern.permute.xlu2 %v2515_v3  ;;  %2377 = vset.pattern.permute.xlu1 %v2515_v3  ;;  %v2615_v5 = vld [vmem:[%s4252_s2 + $0x18] sm:$0xff]  ;;  %v2620_v6 = vld [vmem:[%s4252_s2 + $0x8] sm:$0xff]  ;;  %v2518_v28 = vmov 3   ;;  %v2519_v43 = vmov 4  }
   0x8   :  { %2376 = vset.pattern.permute.xlu0 %v2515_v3  ;;  %106 = vperm.xlu2 %2378, %v2592_v0   ;;  %4279 = vst [vmem:[#allocation9_spill] sm:$0xff] %v2610_v4  ;;  %v2628_v7 = vld [vmem:[%s4252_s2 + $0x40] sm:$0xff]  ;;  %v2633_v8 = vld [vmem:[%s4252_s2 + $0x38] sm:$0xff]  ;;  %v2638_v9 = vld [vmem:[%s4252_s2 + $0x30] sm:$0xff]  ;;  %v2520_v56 = vmov 5   ;;  %vm1629_vm0 = vcmask 261120  }
   0x9   :  { %96 = vperm.xlu1 %2377, %v2597_v1   ;;  %86 = vperm.xlu0 %2376, %v2602_v2   ;;  %4280 = vst [vmem:[#allocation10_spill] sm:$0xff] %v2628_v7  ;;  %v2646_v10 = vld [vmem:[%s4252_s2 + $0x58] sm:$0xff]  ;;  %v2651_v11 = vld [vmem:[%s4252_s2 + $0x50] sm:$0xff]  ;;  %v2656_v12 = vld [vmem:[%s4252_s2 + $0x48] sm:$0xff]  ;;  %vm1996_vm1 = vcmask 80896   ;;  %vm2102_vm2 = vcmask 130112  }
   0xa   :  { %4281 = vst [vmem:[#allocation11_spill] sm:$0xff] %v2633_v8  ;;  %v2664_v13 = vld [vmem:[%s4252_s2 + $0x70] sm:$0xff]  ;;  %v2669_v14 = vld [vmem:[%s4252_s2 + $0x68] sm:$0xff]  ;;  %v2674_v15 = vld [vmem:[%s4252_s2 + $0x60] sm:$0xff]  ;;  %vm2106_vm3 = vcmask 195712   ;;  %vm2110_vm4 = vcmask 261312  }
   0xb   :  { %4282 = vst [vmem:[#allocation12_spill] sm:$0xff] %v2651_v11  ;;  %v2682_v16 = vld [vmem:[%s4252_s2 + $0x78] sm:$0xff]  ;;  %vm2114_vm5 = vcmask 326912   ;;  %vm2118_vm6 = vcmask 392512   ;;  %vm2122_vm7 = vcmask 458112   ;;  %vm2126_vm8 = vcmask 523712  }
   0xc   :  { %4283 = vst [vmem:[#allocation13_spill] sm:$0xff] %v2669_v14  ;;  %vm2130_vm9 = vcmask 589312   ;;  %vm2134_vm10 = vcmask 654912   ;;  %vm2138_vm11 = vcmask 720512   ;;  %vm2142_vm12 = vcmask 786112   ;;  %s2169_s17 = sshll.u32 %s4261_s11, 4  ;;  %s2170_s17 = int_to_ptr.hbm [resolvable:$true] %s2169_s17 }
   0xd   :  { %vm2146_vm13 = vcmask 851712   ;;  %vm2150_vm14 = vcmask 917312   ;;  %vm2154_vm15 = vcmask 982912  }
  0x10   :  { %111 = vperm.xlu2 %2378, %v2610_v4  }
  0x11   :  { %101 = vperm.xlu1 %2377, %v2615_v5   ;;  %91 = vperm.xlu0 %2376, %v2620_v6  }
  0x18   :  { %126 = vperm.xlu2 %2378, %v2628_v7  }
  0x19   :  { %121 = vperm.xlu1 %2377, %v2633_v8   ;;  %116 = vperm.xlu0 %2376, %v2638_v9  }
  0x20   :  { %141 = vperm.xlu2 %2378, %v2646_v10  }
  0x21   :  { %136 = vperm.xlu1 %2377, %v2651_v11   ;;  %131 = vperm.xlu0 %2376, %v2656_v12  }
  0x28   :  { %156 = vperm.xlu2 %2378, %v2664_v13  }
  0x29   :  { %151 = vperm.xlu1 %2377, %v2669_v14   ;;  %146 = vperm.xlu0 %2376, %v2674_v15  }
  0x30   :  { %2380 = vset.pattern.permute.xlu2 %v2516_v17 }
  0x31   :  { %2379 = vset.pattern.permute.xlu1 %v2516_v17  ;;  %161 = vperm.xlu0 %2376, %v2682_v16  }
  0x32   :  { %250 = vperm.xlu2 %2380, %v2620_v6   ;;  %246 = vperm.xlu1 %2379, %v2602_v2  }
  0x39   :  { %2381 = vset.pattern.permute.xlu0 %v2516_v17 }
  0x3a   :  { %262 = vperm.xlu2 %2380, %v2592_v0   ;;  %258 = vperm.xlu1 %2379, %v2615_v5  }
  0x3b   :  { %254 = vperm.xlu0 %2381, %v2597_v1  }
  0x42   :  { %270 = vperm.xlu2 %2380, %v2638_v9   ;;  %266 = vperm.xlu1 %2379, %v2610_v4  }
  0x43   :  { %274 = vperm.xlu0 %2381, %v2633_v8  }
  0x4a   :  { %282 = vperm.xlu2 %2380, %v2656_v12   ;;  %278 = vperm.xlu1 %2379, %v2628_v7  }
  0x4b   :  { %286 = vperm.xlu0 %2381, %v2651_v11  }
  0x52   :  { %294 = vperm.xlu2 %2380, %v2674_v15   ;;  %290 = vperm.xlu1 %2379, %v2646_v10  }
  0x53   :  { %298 = vperm.xlu0 %2381, %v2669_v14  }
  0x5a   :  { %306 = vperm.xlu2 %2380, %v2682_v16   ;;  %302 = vperm.xlu1 %2379, %v2664_v13  }
  0x5b   :  { %2382 = vset.pattern.permute.xlu0 %v2517_v18 }
  0x5c   :  { %391 = vperm.xlu0 %2382, %v2602_v2  }
  0x62   :  { %2384 = vset.pattern.permute.xlu2 %v2517_v18  ;;  %2383 = vset.pattern.permute.xlu1 %v2517_v18  ;;  %v2702_v19 = vpop.permute.xlu2 %106 }
  0x63   :  { %4284 = vst [vmem:[#allocation14_spill] sm:$0xff] %v2702_v19  ;;  %399 = vperm.xlu2 %2384, %v2597_v1   ;;  %395 = vperm.xlu1 %2383, %v2620_v6  }
  0x64   :  { %411 = vperm.xlu0 %2382, %v2610_v4  }
  0x6a   :  { %v2707_v20 = vpop.permute.xlu2 %111 }
  0x6b   :  { %4285 = vst [vmem:[#allocation15_spill] sm:$0xff] %v2707_v20  ;;  %407 = vperm.xlu2 %2384, %v2592_v0   ;;  %403 = vperm.xlu1 %2383, %v2615_v5   ;;  %v2185_v20 = vld [vmem:[%s4250_s0 + $0xb0] sm:$0xff] }
  0x6c   :  { %423 = vperm.xlu0 %2382, %v2628_v7  }
  0x72   :  { %v2712_v21 = vpop.permute.xlu2 %126 }
  0x73   :  { %4286 = vst [vmem:[#allocation16_spill] sm:$0xff] %v2712_v21  ;;  %419 = vperm.xlu2 %2384, %v2633_v8   ;;  %415 = vperm.xlu1 %2383, %v2638_v9   ;;  %v82_v21 = vld [vmem:[%s4250_s0 + $0x70] sm:$0xff] }
  0x74   :  { %435 = vperm.xlu0 %2382, %v2646_v10  }
  0x7a   :  { %v2717_v22 = vpop.permute.xlu2 %141 }
  0x7b   :  { %4287 = vst [vmem:[#allocation17_spill] sm:$0xff] %v2717_v22  ;;  %v2719_v23 = vpop.permute.xlu1 %96  ;;  %431 = vperm.xlu2 %2384, %v2651_v11   ;;  %427 = vperm.xlu1 %2383, %v2656_v12   ;;  %v2723_v24 = vpop.permute.xlu0 %86 }
  0x7c   :  { %447 = vperm.xlu0 %2382, %v2664_v13  }
  0x82   :  { %v2726_v25 = vpop.permute.xlu2 %156 }
  0x83   :  { %v2728_v26 = vpop.permute.xlu1 %101  ;;  %443 = vperm.xlu2 %2384, %v2669_v14   ;;  %439 = vperm.xlu1 %2383, %v2674_v15   ;;  %v2732_v27 = vpop.permute.xlu0 %91 }
  0x84   :  { %4288 = vst [vmem:[#allocation18_spill] sm:$0xff] %v2728_v26  ;;  %2386 = vset.pattern.permute.xlu0 %v2518_v28 }
  0x85   :  { %540 = vperm.xlu0 %2386, %v2620_v6  }
  0x8b   :  { %v2735_v29 = vpop.permute.xlu1 %121  ;;  %2385 = vset.pattern.permute.xlu2 %v2518_v28  ;;  %451 = vperm.xlu1 %2383, %v2682_v16   ;;  %v2738_v30 = vpop.permute.xlu0 %116 }
  0x8c   :  { %v2740_v31 = vpop.permute.xlu2 %250  ;;  %536 = vperm.xlu2 %2385, %v2602_v2  }
  0x8d   :  { %560 = vperm.xlu0 %2386, %v2638_v9  }
  0x93   :  { %v2744_v32 = vpop.permute.xlu1 %136  ;;  %2387 = vset.pattern.permute.xlu1 %v2518_v28  ;;  %v2746_v33 = vpop.permute.xlu0 %131 }
  0x94   :  { %v2748_v34 = vpop.permute.xlu2 %262  ;;  %548 = vperm.xlu2 %2385, %v2615_v5   ;;  %544 = vperm.xlu1 %2387, %v2597_v1  }
  0x95   :  { %4289 = vst [vmem:[#allocation19_spill] sm:$0xff] %v2748_v34  ;;  %572 = vperm.xlu0 %2386, %v2656_v12  }
  0x9b   :  { %v2753_v35 = vpop.permute.xlu1 %151  ;;  %v2755_v36 = vpop.permute.xlu0 %146 }
  0x9c   :  { %556 = vperm.xlu2 %2385, %v2610_v4   ;;  %552 = vperm.xlu1 %2387, %v2592_v0   ;;  %v2759_v37 = vpop.permute.xlu2 %270 }
  0x9d   :  { %584 = vperm.xlu0 %2386, %v2674_v15  }
  0xa3   :  { %v2762_v38 = vpop.permute.xlu0 %161 }
  0xa4   :  { %568 = vperm.xlu2 %2385, %v2628_v7   ;;  %564 = vperm.xlu1 %2387, %v2633_v8   ;;  %v2766_v39 = vpop.permute.xlu1 %246  ;;  %v2768_v40 = vpop.permute.xlu2 %282 }
  0xa5   :  { %596 = vperm.xlu0 %2386, %v2682_v16  }
  0xac   :  { %580 = vperm.xlu2 %2385, %v2646_v10   ;;  %576 = vperm.xlu1 %2387, %v2651_v11   ;;  %v2773_v41 = vpop.permute.xlu1 %258  ;;  %v2775_v42 = vpop.permute.xlu2 %294 }
  0xad   :  { %4290 = vst [vmem:[#allocation20_spill] sm:$0xff] %v2773_v41  ;;  %2390 = vset.pattern.permute.xlu0 %v2519_v43  ;;  %v2777_v44 = vpop.permute.xlu0 %254 }
  0xae   :  { %689 = vperm.xlu0 %2390, %v2597_v1  }
  0xb4   :  { %592 = vperm.xlu2 %2385, %v2664_v13   ;;  %588 = vperm.xlu1 %2387, %v2669_v14   ;;  %v2782_v45 = vpop.permute.xlu1 %266  ;;  %v2784_v46 = vpop.permute.xlu2 %306 }
  0xb5   :  { %4291 = vst [vmem:[#allocation21_spill] sm:$0xff] %v2782_v45  ;;  %v2786_v47 = vpop.permute.xlu0 %274  ;;  %v2191_v45 = vld [vmem:[%s4250_s0 + $0xe0] sm:$0xff] }
  0xb6   :  { %709 = vperm.xlu0 %2390, %v2633_v8  }
  0xbc   :  { %2389 = vset.pattern.permute.xlu2 %v2519_v43  ;;  %2388 = vset.pattern.permute.xlu1 %v2519_v43  ;;  %v2789_v48 = vpop.permute.xlu1 %278 }
  0xbd   :  { %4292 = vst [vmem:[#allocation22_spill] sm:$0xff] %v2789_v48  ;;  %v2791_v49 = vpop.permute.xlu0 %286  ;;  %v2793_v50 = vpop.permute.xlu2 %399  ;;  %685 = vperm.xlu2 %2389, %v2620_v6   ;;  %681 = vperm.xlu1 %2388, %v2602_v2   ;;  %v75_v48 = vld [vmem:[%s4250_s0 + $0x38] sm:$0xff] }
  0xbe   :  { %721 = vperm.xlu0 %2390, %v2651_v11  }
  0xc4   :  { %v2798_v51 = vpop.permute.xlu1 %290 }
  0xc5   :  { %4293 = vst [vmem:[#allocation23_spill] sm:$0xff] %v2798_v51  ;;  %v2800_v52 = vpop.permute.xlu0 %298  ;;  %v2802_v53 = vpop.permute.xlu2 %407  ;;  %697 = vperm.xlu2 %2389, %v2592_v0   ;;  %693 = vperm.xlu1 %2388, %v2615_v5   ;;  %v2180_v51 = vld [vmem:[%s4250_s0 + $0x88] sm:$0xff] }
  0xc6   :  { %4294 = vst [vmem:[#allocation24_spill] sm:$0xff] %v2802_v53  ;;  %733 = vperm.xlu0 %2390, %v2669_v14  }
  0xcc   :  { %v2807_v54 = vpop.permute.xlu1 %302 }
  0xcd   :  { %v2809_v55 = vpop.permute.xlu2 %419  ;;  %705 = vperm.xlu2 %2389, %v2638_v9   ;;  %701 = vperm.xlu1 %2388, %v2610_v4  }
  0xce   :  { %2391 = vset.pattern.permute.xlu0 %v2520_v56  ;;  %v2813_v57 = vpop.permute.xlu0 %391 }
  0xcf   :  { %826 = vperm.xlu0 %2391, %v2602_v2  }
  0xd5   :  { %v2816_v58 = vpop.permute.xlu2 %431  ;;  %717 = vperm.xlu2 %2389, %v2656_v12   ;;  %713 = vperm.xlu1 %2388, %v2628_v7   ;;  %v2820_v59 = vpop.permute.xlu1 %395 }
  0xd6   :  { %v2822_v60 = vpop.permute.xlu0 %411 }
  0xd7   :  { %4295 = vst [vmem:[#allocation25_spill] sm:$0xff] %v2822_v60  ;;  %846 = vperm.xlu0 %2391, %v2610_v4   ;;  %v178_v60 = vmul.f32 %v2726_v25, %v82_v21  ;;  %v83_v21 = vld [vmem:[%s4250_s0 + $0x78] sm:$0xff] }
  0xdd   :  { %v2825_v61 = vpop.permute.xlu2 %443  ;;  %729 = vperm.xlu2 %2389, %v2674_v15   ;;  %725 = vperm.xlu1 %2388, %v2646_v10   ;;  %v2829_v62 = vpop.permute.xlu1 %403 }
  0xde   :  { %4296 = vst [vmem:[#allocation26_spill] sm:$0xff] %v2829_v62  ;;  %v2831_v63 = vpop.permute.xlu0 %423 }
  0xdf   :  { %4297 = vst [vmem:[#allocation27_spill] sm:$0xff] %v2831_v63  ;;  %858 = vperm.xlu0 %2391, %v2628_v7   ;;  %v4264_v63 = vmov 6  }
  0xe5   :  { %741 = vperm.xlu2 %2389, %v2682_v16   ;;  %737 = vperm.xlu1 %2388, %v2664_v13   ;;  %v2836_v3 = vpop.permute.xlu1 %415 }
  0xe6   :  { %v2838_v17 = vpop.permute.xlu0 %435  ;;  %v2840_v18 = vpop.permute.xlu2 %536 }
  0xe7   :  { %4298 = vst [vmem:[#allocation28_spill] sm:$0xff] %v2838_v17  ;;  %870 = vperm.xlu0 %2391, %v2646_v10  }
  0xe8   :  { %4299 = vst [vmem:[#allocation29_spill] sm:$0xff] %v2840_v18 }
  0xed   :  { %2393 = vset.pattern.permute.xlu2 %v2520_v56  ;;  %2392 = vset.pattern.permute.xlu1 %v2520_v56  ;;  %v2843_v28 = vpop.permute.xlu1 %427  ;;  %v4262_v56 = vmov 8  }
  0xee   :  { %4300 = vst [vmem:[#allocation30_spill] sm:$0xff] %v2843_v28  ;;  %v448_v43 = vpop.permute.xlu0 %447  ;;  %834 = vperm.xlu2 %2393, %v2597_v1   ;;  %v2846_v62 = vpop.permute.xlu2 %548  ;;  %830 = vperm.xlu1 %2392, %v2620_v6  }
  0xef   :  { %4301 = vst [vmem:[#allocation31_spill] sm:$0xff] %v2846_v62  ;;  %882 = vperm.xlu0 %2391, %v2664_v13   ;;  %v70_v13 = vld [vmem:[%s4250_s0 + $0x10] sm:$0xff] }
  0xf0   :  { %v2879_v22 = vmul.f32 %v2719_v23, %v70_v13  ;;  %v74_v23 = vld [vmem:[%s4250_s0 + $0x30] sm:$0xff] }
  0xf1   :  { %v2193_v13 = vld [vmem:[%s4250_s0 + $0xf0] sm:$0xff] }
  0xf2   :  { %v323_v25 = vmul.f32 %v2193_v13, %v2807_v54  ;;  %v2207_v54 = vld [vmem:[%s4250_s0 + $0x160] sm:$0xff] }
  0xf5   :  { %v2850_v26 = vpop.permute.xlu1 %439 }
  0xf6   :  { %842 = vperm.xlu2 %2393, %v2592_v0   ;;  %v2853_v41 = vpop.permute.xlu2 %556  ;;  %838 = vperm.xlu1 %2392, %v2615_v5  }
  0xf7   :  { %4302 = vst [vmem:[#allocation32_spill] sm:$0xff] %v2853_v41  ;;  %2401 = vset.pattern.permute.xlu0 %v4262_v56  ;;  %v2857_v17 = vpop.permute.xlu0 %540  ;;  %v69_v56 = vld [vmem:[%s4250_s0 + $0x8] sm:$0xff]  ;;  %v2916_v41 = vmul.f32 %v2879_v22, %v2879_v22 }
  0xf8   :  { %1297 = vperm.xlu0 %2401, %v2656_v12   ;;  %v165_v19 = vmul.f32 %v2732_v27, %v69_v56  ;;  %v77_v56 = vld [vmem:[%s4250_s0 + $0x48] sm:$0xff] }
  0xfa   :  { %v197_v7 = vmul.f32 %v165_v19, %v165_v19 }
  0xfd   :  { %v2860_v62 = vpop.permute.xlu1 %451 }
  0xfe   :  { %854 = vperm.xlu2 %2393, %v2633_v8   ;;  %v2866_v53 = vpop.permute.xlu2 %568  ;;  %850 = vperm.xlu1 %2392, %v2638_v9   ;;  %v2209_v8 = vld [vmem:[%s4250_s0 + $0x170] sm:$0xff] }
  0xff   :  { %4303 = vst [vmem:[#allocation33_spill] sm:$0xff] %v2866_v53  ;;  %v2875_v34 = vpop.permute.xlu0 %560  ;;  %v68_v53 = vld [vmem:[%s4250_s0] sm:$0xff] }
 0x100   :  { %4304 = vst [vmem:[#allocation34_spill] sm:$0xff] %v2875_v34  ;;  %2402 = vset.pattern.permute.xlu0 %v4264_v63  ;;  %v310_v63 = vmul.f32 %v2180_v51, %v2740_v31  ;;  %v2903_v27 = vmul.f32 %v2723_v24, %v68_v53  ;;  %v81_v31 = vld [vmem:[%s4250_s0 + $0x68] sm:$0xff]  ;;  %v80_v51 = vld [vmem:[%s4250_s0 + $0x60] sm:$0xff]  ;;  %v2920_v24 = vmul.f32 %v2735_v29, %v75_v48 }
 0x101   :  { %975 = vperm.xlu0 %2402, %v2620_v6   ;;  %v78_v6 = vld [vmem:[%s4250_s0 + $0x50] sm:$0xff]  ;;  %v170_v53 = vmul.f32 %v2738_v30, %v74_v23  ;;  %v2946_v23 = vmul.f32 %v2746_v33, %v77_v56  ;;  %v2949_v4 = vmul.f32 %v2753_v35, %v81_v31  ;;  %v176_v18 = vmul.f32 %v2755_v36, %v80_v51 }
 0x102   :  { %4305 = vst [vmem:[#allocation35_spill] sm:$0xff] %v2903_v27  ;;  %v342_v0 = vmul.f32 %v310_v63, %v310_v63  ;;  %v2943_v48 = vmul.f32 %v2744_v32, %v78_v6  ;;  %v315_v32 = vmul.f32 %v2185_v20, %v2759_v37  ;;  %v321_v33 = vmul.f32 %v2191_v45, %v2775_v42  ;;  %v2179_v20 = vld [vmem:[%s4250_s0 + $0x80] sm:$0xff] }
 0x103   :  { %4307 = vst [vmem:[#allocation37_spill] sm:$0xff] %v2946_v23  ;;  %v468_v6 = vmul.f32 %v2209_v8, %v448_v43  ;;  %v210_v56 = vmul.f32 %v178_v60, %v178_v60  ;;  %v2965_v35 = vmul.f32 %v2920_v24, %v2920_v24  ;;  %v202_v36 = vmul.f32 %v170_v53, %v170_v53  ;;  %v2181_v8 = vld [vmem:[%s4250_s0 + $0x90] sm:$0xff]  ;;  %v2196_v43 = vld [vmem:[%s4250_s0 + $0x108] sm:$0xff] }
 0x104   :  { %4308 = vst [vmem:[#allocation38_spill] sm:$0xff] %v2949_v4  ;;  %v2968_v31 = vmul.f32 %v2762_v38, %v83_v21  ;;  %v2971_v51 = vadd.f32 %v310_v63, %v165_v19  ;;  %v355_v37 = vmul.f32 %v323_v25, %v323_v25  ;;  %v466_v42 = vmul.f32 %v2207_v54, %v2850_v26  ;;  %v2194_v26 = vld [vmem:[%s4250_s0 + $0xf8] sm:$0xff]  ;;  %v2225_v54 = vld [vmem:[%s4250_s0 + $0x1f0] sm:$0xff] }
 0x105   :  { %v2984_v38 = vmul.f32 %v2943_v48, %v2943_v48  ;;  %v2994_v19 = vadd.f32 %v315_v32, %v170_v53  ;;  %v347_v45 = vmul.f32 %v315_v32, %v315_v32  ;;  %v353_v63 = vmul.f32 %v321_v33, %v321_v33 }
 0x106   :  { %866 = vperm.xlu2 %2393, %v2651_v11   ;;  %v2937_v29 = vpop.permute.xlu2 %580  ;;  %862 = vperm.xlu1 %2392, %v2656_v12   ;;  %v2940_v30 = vpop.permute.xlu1 %544  ;;  %v500_v21 = vmul.f32 %v468_v6, %v468_v6  ;;  %v211_v53 = vmul.f32 %v2968_v31, %v2968_v31  ;;  %v3011_v32 = vmul.f32 %v2181_v8, %v2777_v44 }
 0x107   :  { %4306 = vst [vmem:[#allocation36_spill] sm:$0xff] %v2937_v29  ;;  %v2955_v13 = vpop.permute.xlu0 %572  ;;  %v2959_v29 = vmul.f32 %v2903_v27, %v2903_v27  ;;  %v2973_v27 = vadd.f32 %v342_v0, %v197_v7  ;;  %v2992_v0 = vmul.f32 %v2949_v4, %v2949_v4  ;;  %v208_v7 = vmul.f32 %v176_v18, %v176_v18 }
 0x108   :  { %4309 = vst [vmem:[#allocation39_spill] sm:$0xff] %v2955_v13  ;;  %v337_v11 = vadd.f32 %v321_v33, %v176_v18  ;;  %v371_v13 = vadd.f32 %v355_v37, %v210_v56  ;;  %v498_v28 = vmul.f32 %v466_v42, %v466_v42  ;;  %v2186_v18 = vld [vmem:[%s4250_s0 + $0xb8] sm:$0xff]  ;;  %v455_v33 = vmul.f32 %v2196_v43, %v2820_v59 }
 0x109   :  { %4310 = vst [vmem:[#allocation40_spill] sm:$0xff] %v2959_v29  ;;  %995 = vperm.xlu0 %2402, %v2638_v9   ;;  %v2988_v9 = vmul.f32 %v2946_v23, %v2946_v23  ;;  %v339_v23 = vadd.f32 %v323_v25, %v178_v60  ;;  %v2223_v29 = vld [vmem:[%s4250_s0 + $0x1e0] sm:$0xff]  ;;  %v324_v25 = vmul.f32 %v2194_v26, %v2784_v46 }
 0x10a   :  { %4312 = vst [vmem:[#allocation42_spill] sm:$0xff] %v2992_v0  ;;  %v369_v37 = vadd.f32 %v353_v63, %v208_v7  ;;  %v516_v0 = vadd.f32 %v500_v21, %v371_v13  ;;  %v3051_v63 = vadd.f32 %v347_v45, %v202_v36  ;;  %v2226_v45 = vld [vmem:[%s4250_s0 + $0x1f8] sm:$0xff]  ;;  %v471_v21 = vadd.f32 %v455_v33, %v2971_v51  ;;  %v2192_v51 = vld [vmem:[%s4250_s0 + $0xe8] sm:$0xff] }
 0x10b   :  { %4311 = vst [vmem:[#allocation41_spill] sm:$0xff] %v2988_v9  ;;  %v3006_v9 = vmul.f32 %v2179_v20, %v2766_v39  ;;  %v2210_v39 = vld [vmem:[%s4250_s0 + $0x178] sm:$0xff]  ;;  %v484_v56 = vadd.f32 %v468_v6, %v339_v23  ;;  %v316_v6 = vmul.f32 %v2186_v18, %v2786_v47  ;;  %v356_v7 = vmul.f32 %v324_v25, %v324_v25 }
 0x10c   :  { %4313 = vst [vmem:[#allocation43_spill] sm:$0xff] %v2994_v19  ;;  %v2212_v19 = vld [vmem:[%s4250_s0 + $0x188] sm:$0xff]  ;;  %v469_v46 = vmul.f32 %v2210_v39, %v2860_v62  ;;  %v340_v43 = vadd.f32 %v324_v25, %v2968_v31 }
 0x10d   :  { %v600_v4 = vmul.f32 %v2212_v19, %v2857_v17  ;;  %v487_v19 = vmul.f32 %v455_v33, %v455_v33  ;;  %v348_v26 = vmul.f32 %v316_v6, %v316_v6 }
 0x10e   :  { %878 = vperm.xlu2 %2393, %v2669_v14   ;;  %v593_v44 = vpop.permute.xlu2 %592  ;;  %874 = vperm.xlu1 %2392, %v2674_v15   ;;  %v3024_v60 = vpop.permute.xlu1 %552  ;;  %v2189_v14 = vld [vmem:[%s4250_s0 + $0xd0] sm:$0xff]  ;;  %v482_v15 = vadd.f32 %v466_v42, %v337_v11  ;;  %v485_v33 = vadd.f32 %v469_v46, %v340_v43 }
 0x10f   :  { %4314 = vst [vmem:[#allocation44_spill] sm:$0xff] %v3024_v60  ;;  %v613_v20 = vmul.f32 %v2225_v54, %v593_v44  ;;  %v585_v8 = vpop.permute.xlu0 %584  ;;  %v2188_v60 = vld [vmem:[%s4250_s0 + $0xc8] sm:$0xff]  ;;  %v2197_v11 = vld [vmem:[%s4250_s0 + $0x110] sm:$0xff]  ;;  %v319_v17 = vmul.f32 %v2189_v14, %v2791_v49  ;;  %v343_v14 = vmul.f32 %v3011_v32, %v3011_v32  ;;  %v632_v36 = vmul.f32 %v600_v4, %v600_v4 }
 0x110   :  { %v611_v34 = vmul.f32 %v2223_v29, %v585_v8  ;;  %v514_v29 = vadd.f32 %v498_v28, %v369_v37  ;;  %v3058_v47 = vmul.f32 %v2188_v60, %v2768_v40  ;;  %v2205_v28 = vld [vmem:[%s4250_s0 + $0x150] sm:$0xff]  ;;  %v456_v49 = vmul.f32 %v2197_v11, %v2793_v50  ;;  %v2228_v40 = vld [vmem:[%s4250_s0 + $0x208] sm:$0xff] }
 0x111   :  { %v3039_v59 = vadd.f32 %v613_v20, %v484_v56  ;;  %v645_v23 = vmul.f32 %v613_v20, %v613_v20  ;;  %1007 = vperm.xlu0 %2402, %v2656_v12   ;;  %v3055_v12 = vmul.f32 %v3006_v9, %v3006_v9  ;;  %v2213_v54 = vld [vmem:[%s4250_s0 + $0x190] sm:$0xff]  ;;  %v4315_v50 = vmov 6  }
 0x112   :  { %v3046_v13 = vadd.f32 %v611_v34, %v482_v15  ;;  %v643_v42 = vmul.f32 %v611_v34, %v611_v34  ;;  %v372_v44 = vadd.f32 %v356_v7, %v211_v53  ;;  %v351_v60 = vmul.f32 %v319_v17, %v319_v17  ;;  %v2202_v53 = vld [vmem:[%s4250_s0 + $0x138] sm:$0xff] }
 0x113   :  { %v3049_v62 = vadd.f32 %v645_v23, %v516_v0  ;;  %v501_v0 = vmul.f32 %v469_v46, %v469_v46  ;;  %v464_v18 = vmul.f32 %v2205_v28, %v2816_v58  ;;  %v503_v56 = vadd.f32 %v487_v19, %v2973_v27 }
 0x114   :  { %v3063_v34 = vadd.f32 %v643_v42, %v514_v29  ;;  %v616_v25 = vadd.f32 %v600_v4, %v471_v21  ;;  %v488_v37 = vmul.f32 %v456_v49, %v456_v49  ;;  %v601_v27 = vmul.f32 %v2213_v54, %v2940_v30  ;;  %v2208_v30 = vld [vmem:[%s4250_s0 + $0x168] sm:$0xff] }
 0x115   :  { %v648_v58 = vadd.f32 %v632_v36, %v503_v56  ;;  %v517_v15 = vadd.f32 %v501_v0, %v372_v44  ;;  %v327_v46 = vadd.f32 %v3011_v32, %v2879_v22  ;;  %v359_v42 = vadd.f32 %v343_v14, %v2916_v41  ;;  %v2221_v22 = vld [vmem:[%s4250_s0 + $0x1d0] sm:$0xff] }
 0x116   :  { %2394 = vset.pattern.permute.xlu2 %v4315_v50  ;;  %886 = vperm.xlu1 %2392, %v2682_v16   ;;  %v3081_v39 = vpop.permute.xlu1 %564  ;;  %v332_v7 = vadd.f32 %v316_v6, %v2920_v24  ;;  %v322_v19 = vmul.f32 %v2192_v51, %v2800_v52  ;;  %v496_v28 = vmul.f32 %v464_v18, %v464_v18  ;;  %v2201_v6 = vld [vmem:[%s4250_s0 + $0x130] sm:$0xff] }
 0x117   :  { %v597_v20 = vpop.permute.xlu0 %596  ;;  %971 = vperm.xlu2 %2394, %v2602_v2   ;;  %v686_v31 = vpop.permute.xlu2 %685  ;;  %v364_v41 = vadd.f32 %v348_v26, %v2965_v35  ;;  %v335_v24 = vadd.f32 %v319_v17, %v2943_v48  ;;  %v367_v52 = vadd.f32 %v351_v60, %v2984_v38  ;;  %v472_v32 = vadd.f32 %v456_v49, %v327_v46  ;;  %v2229_v48 = vld [vmem:[%s4250_s0 + $0x210] sm:$0xff]  ;;  %v2218_v60 = vld [vmem:[%s4250_s0 + $0x1b8] sm:$0xff] }
 0x118   :  { %v614_v8 = vmul.f32 %v2226_v45, %v597_v20  ;;  %v745_v16 = vmul.f32 %v2228_v40, %v686_v31  ;;  %v504_v14 = vadd.f32 %v488_v37, %v359_v42  ;;  %v467_v45 = vmul.f32 %v2208_v30, %v2825_v61  ;;  %v2217_v49 = vld [vmem:[%s4250_s0 + $0x1b0] sm:$0xff] }
 0x119   :  { %1015 = vperm.xlu0 %2402, %v2646_v10   ;;  %v461_v10 = vmul.f32 %v2202_v53, %v2809_v55  ;;  %v2195_v55 = vld [vmem:[%s4250_s0 + $0x100] sm:$0xff]  ;;  %v633_v40 = vmul.f32 %v601_v27, %v601_v27  ;;  %v354_v38 = vmul.f32 %v322_v19, %v322_v19  ;;  %v480_v17 = vadd.f32 %v464_v18, %v335_v24  ;;  %v2220_v24 = vld [vmem:[%s4250_s0 + $0x1c8] sm:$0xff] }
 0x11a   :  { %v3094_v23 = vadd.f32 %v614_v8, %v485_v33  ;;  %v646_v11 = vmul.f32 %v614_v8, %v614_v8  ;;  %v3096_v29 = vadd.f32 %v745_v16, %v616_v25  ;;  %v777_v4 = vmul.f32 %v745_v16, %v745_v16  ;;  %v4317_v8 = vld [vmem:[#allocation34_spill] sm:$0xff] }
 0x11b   :  { %v493_v61 = vmul.f32 %v461_v10, %v461_v10  ;;  %v3136_v21 = vmul.f32 %v2195_v55, %v2813_v57  ;;  %v512_v54 = vadd.f32 %v496_v28, %v367_v52  ;;  %v460_v44 = vmul.f32 %v2201_v6, %v2836_v3  ;;  %v2204_v3 = vld [vmem:[%s4250_s0 + $0x148] sm:$0xff]  ;;  %v4320_v6 = vld [vmem:[#allocation30_spill] sm:$0xff] }
 0x11c   :  { %v3107_v36 = vadd.f32 %v646_v11, %v517_v15  ;;  %v3109_v0 = vadd.f32 %v777_v4, %v648_v58  ;;  %v617_v56 = vadd.f32 %v601_v27, %v472_v32  ;;  %v4276_v25 = vmov 7   ;;  %v4318_v4 = vld [vmem:[#allocation42_spill] sm:$0xff]  ;;  %v4319_v32 = vld [vmem:[#allocation43_spill] sm:$0xff] }
 0x11d   :  { %v499_v57 = vmul.f32 %v467_v45, %v467_v45  ;;  %v605_v16 = vmul.f32 %v2217_v49, %v4317_v8  ;;  %v649_v37 = vadd.f32 %v633_v40, %v504_v14  ;;  %v606_v53 = vmul.f32 %v2218_v60, %v3081_v39  ;;  %v2224_v39 = vld [vmem:[%s4250_s0 + $0x1e8] sm:$0xff]  ;;  %v4324_v60 = vld [vmem:[#allocation39_spill] sm:$0xff] }
 0x11e   :  { %2395 = vset.pattern.permute.xlu1 %v4315_v50  ;;  %v577_v35 = vpop.permute.xlu1 %576  ;;  %v350_v11 = vmul.f32 %v3058_v47, %v3058_v47  ;;  %v370_v46 = vadd.f32 %v354_v38, %v4318_v4  ;;  %v477_v42 = vadd.f32 %v461_v10, %v332_v7  ;;  %v509_v30 = vadd.f32 %v493_v61, %v364_v41  ;;  %v2233_v7 = vld [vmem:[%s4250_s0 + $0x230] sm:$0xff]  ;;  %v4323_v61 = vld [vmem:[#allocation8_spill] sm:$0xff] }
 0x11f   :  { %v609_v26 = vmul.f32 %v2221_v22, %v577_v35  ;;  %983 = vperm.xlu2 %2394, %v2615_v5   ;;  %v3132_v43 = vpop.permute.xlu2 %697  ;;  %979 = vperm.xlu1 %2395, %v2597_v1   ;;  %v4316_v1 = vld [vmem:[#allocation38_spill] sm:$0xff]  ;;  %v486_v28 = vmul.f32 %v3136_v21, %v3136_v21  ;;  %v476_v55 = vadd.f32 %v460_v44, %v4319_v32  ;;  %v4321_v35 = vld [vmem:[#allocation29_spill] sm:$0xff]  ;;  %v4325_v4 = vld [vmem:[#allocation12_spill] sm:$0xff] }
 0x120   :  { %v690_v18 = vpop.permute.xlu0 %689  ;;  %v338_v33 = vadd.f32 %v322_v19, %v4316_v1  ;;  %v492_v19 = vmul.f32 %v460_v44, %v460_v44  ;;  %v515_v10 = vadd.f32 %v499_v57, %v370_v46  ;;  %v463_v14 = vmul.f32 %v2204_v3, %v4320_v6  ;;  %v4322_v49 = vld [vmem:[#allocation9_spill] sm:$0xff] }
 0x121   :  { %v3142_v20 = vadd.f32 %v609_v26, %v480_v17  ;;  %v641_v31 = vmul.f32 %v609_v26, %v609_v26  ;;  %v746_v51 = vmul.f32 %v2229_v48, %v690_v18  ;;  %2408 = vset.pattern.permute.xlu0 %v4276_v25  ;;  %v637_v41 = vmul.f32 %v605_v16, %v605_v16  ;;  %v4329_v32 = vld [vmem:[#allocation41_spill] sm:$0xff] }
 0x122   :  { %1116 = vperm.xlu0 %2408, %v2602_v2   ;;  %v2211_v2 = vld [vmem:[%s4250_s0 + $0x180] sm:$0xff]  ;;  %v483_v22 = vadd.f32 %v467_v45, %v338_v33  ;;  %v2234_v45 = vld [vmem:[%s4250_s0 + $0x238] sm:$0xff]  ;;  %v638_v38 = vmul.f32 %v606_v53, %v606_v53  ;;  %v621_v44 = vadd.f32 %v605_v16, %v476_v55  ;;  %v608_v18 = vmul.f32 %v2220_v24, %v4324_v60 }
 0x123   :  { %v3152_v58 = vadd.f32 %v641_v31, %v512_v54  ;;  %v3154_v15 = vadd.f32 %v746_v51, %v617_v56  ;;  %v778_v27 = vmul.f32 %v746_v51, %v746_v51  ;;  %v599_v48 = vmul.f32 %v2211_v2, %v4321_v35  ;;  %v4330_v35 = vld [vmem:[#allocation10_spill] sm:$0xff] }
 0x124   :  { %v508_v54 = vadd.f32 %v492_v19, %v3051_v63  ;;  %v622_v51 = vadd.f32 %v606_v53, %v477_v42  ;;  %v495_v8 = vmul.f32 %v463_v14, %v463_v14  ;;  %v654_v46 = vadd.f32 %v638_v38, %v509_v30  ;;  %v4326_v19 = vld [vmem:[#allocation35_spill] sm:$0xff]  ;;  %v4327_v42 = vld [vmem:[#allocation40_spill] sm:$0xff] }
 0x125   :  { %v3170_v52 = vadd.f32 %v778_v27, %v649_v37  ;;  %v325_v53 = vadd.f32 %v3006_v9, %v4326_v19  ;;  %v366_v55 = vadd.f32 %v350_v11, %v4329_v32  ;;  %v631_v6 = vmul.f32 %v599_v48, %v599_v48  ;;  %v2227_v9 = vld [vmem:[%s4250_s0 + $0x200] sm:$0xff] }
 0x126   :  { %v589_v40 = vpop.permute.xlu1 %588  ;;  %v653_v37 = vadd.f32 %v637_v41, %v508_v54  ;;  %v640_v30 = vmul.f32 %v608_v18, %v608_v18  ;;  %v2236_v41 = vld [vmem:[%s4250_s0 + $0x248] sm:$0xff] }
 0x127   :  { %v612_v17 = vmul.f32 %v2224_v39, %v589_v40  ;;  %991 = vperm.xlu2 %2394, %v4322_v49   ;;  %v706_v26 = vpop.permute.xlu2 %705  ;;  %987 = vperm.xlu1 %2395, %v4323_v61   ;;  %v357_v39 = vadd.f32 %v3055_v12, %v4327_v42  ;;  %v470_v12 = vadd.f32 %v3136_v21, %v325_v53  ;;  %v2216_v53 = vld [vmem:[%s4250_s0 + $0x1a8] sm:$0xff] }
 0x128   :  { %v750_v56 = vmul.f32 %v2233_v7, %v706_v26  ;;  %v710_v31 = vpop.permute.xlu0 %709  ;;  %v2240_v42 = vld [vmem:[%s4250_s0 + $0x268] sm:$0xff] }
 0x129   :  { %v3185_v1 = vadd.f32 %v612_v17, %v483_v22  ;;  %v644_v33 = vmul.f32 %v612_v17, %v612_v17  ;;  %v751_v57 = vmul.f32 %v2234_v45, %v710_v31  ;;  %v4328_v22 = vld [vmem:[#allocation37_spill] sm:$0xff]  ;;  %v502_v11 = vadd.f32 %v486_v28, %v357_v39  ;;  %v4331_v17 = vld [vmem:[#allocation11_spill] sm:$0xff] }
 0x12a   :  { %v3187_v3 = vadd.f32 %v750_v56, %v621_v44  ;;  %v782_v27 = vmul.f32 %v750_v56, %v750_v56  ;;  %1156 = vperm.xlu0 %2408, %v4325_v4   ;;  %v334_v24 = vadd.f32 %v3058_v47, %v4328_v22  ;;  %v2237_v47 = vld [vmem:[%s4250_s0 + $0x250] sm:$0xff]  ;;  %v511_v45 = vadd.f32 %v495_v8, %v366_v55  ;;  %v2184_v31 = vld [vmem:[%s4250_s0 + $0xa8] sm:$0xff]  ;;  %v4333_v39 = vld [vmem:[#allocation15_spill] sm:$0xff] }
 0x12b   :  { %v3190_v2 = vadd.f32 %v644_v33, %v515_v10  ;;  %v3192_v63 = vadd.f32 %v751_v57, %v622_v51  ;;  %v783_v16 = vmul.f32 %v751_v57, %v751_v57  ;;  %v615_v26 = vadd.f32 %v599_v48, %v470_v12  ;;  %v73_v8 = vld [vmem:[%s4250_s0 + $0x28] sm:$0xff] }
 0x12c   :  { %v3200_v7 = vadd.f32 %v782_v27, %v653_v37  ;;  %v479_v40 = vadd.f32 %v463_v14, %v334_v24  ;;  %v647_v56 = vadd.f32 %v631_v6, %v502_v11  ;;  %v656_v21 = vadd.f32 %v640_v30, %v511_v45  ;;  %v2200_v37 = vld [vmem:[%s4250_s0 + $0x128] sm:$0xff]  ;;  %v2187_v11 = vld [vmem:[%s4250_s0 + $0xc0] sm:$0xff] }
 0x12d   :  { %v3203_v10 = vadd.f32 %v783_v16, %v654_v46  ;;  %v4332_v46 = vld [vmem:[#allocation21_spill] sm:$0xff]  ;;  %v169_v22 = vmul.f32 %v4333_v39, %v73_v8  ;;  %v4335_v55 = vmov 8   ;;  %v4336_v12 = vld [vmem:[#allocation32_spill] sm:$0xff]  ;;  %v4338_v8 = vld [vmem:[#allocation14_spill] sm:$0xff] }
 0x12e   :  { %v624_v61 = vadd.f32 %v608_v18, %v479_v40  ;;  %v314_v16 = vmul.f32 %v2184_v31, %v4332_v46  ;;  %v4334_v24 = vld [vmem:[#allocation25_spill] sm:$0xff]  ;;  %v604_v40 = vmul.f32 %v2216_v53, %v4336_v12 }
 0x12f   :  { %1003 = vperm.xlu2 %2394, %v4330_v35   ;;  %v718_v38 = vpop.permute.xlu2 %717  ;;  %999 = vperm.xlu1 %2395, %v4331_v17   ;;  %v682_v49 = vpop.permute.xlu1 %681  ;;  %v459_v32 = vmul.f32 %v2200_v37, %v4334_v24  ;;  %v2524_v17 = vmov 9   ;;  %v4340_v53 = vld [vmem:[#allocation17_spill] sm:$0xff] }
 0x130   :  { %v753_v54 = vmul.f32 %v2236_v41, %v718_v38  ;;  %v744_v44 = vmul.f32 %v2227_v9, %v682_v49  ;;  %v722_v60 = vpop.permute.xlu0 %721  ;;  %v346_v9 = vmul.f32 %v314_v16, %v314_v16  ;;  %v72_v49 = vld [vmem:[%s4250_s0 + $0x20] sm:$0xff] }
 0x131   :  { %v754_v14 = vmul.f32 %v2237_v47, %v722_v60  ;;  %v330_v60 = vadd.f32 %v314_v16, %v169_v22  ;;  %v168_v37 = vmul.f32 %v4338_v8, %v72_v49  ;;  %v4339_v16 = vld [vmem:[#allocation16_spill] sm:$0xff] }
 0x132   :  { %v3220_v28 = vadd.f32 %v753_v54, %v624_v61  ;;  %v785_v51 = vmul.f32 %v753_v54, %v753_v54  ;;  %v3222_v33 = vadd.f32 %v744_v44, %v615_v26  ;;  %v776_v57 = vmul.f32 %v744_v44, %v744_v44  ;;  %1128 = vperm.xlu0 %2408, %v2615_v5   ;;  %v79_v44 = vld [vmem:[%s4250_s0 + $0x58] sm:$0xff] }
 0x133   :  { %v3226_v48 = vadd.f32 %v754_v14, %v3142_v20  ;;  %v786_v18 = vmul.f32 %v754_v14, %v754_v14  ;;  %v2239_v20 = vld [vmem:[%s4250_s0 + $0x260] sm:$0xff]  ;;  %v491_v26 = vmul.f32 %v459_v32, %v459_v32  ;;  %v4337_v14 = vld [vmem:[#allocation22_spill] sm:$0xff]  ;;  %v475_v46 = vadd.f32 %v459_v32, %v330_v60 }
 0x134   :  { %v3234_v27 = vadd.f32 %v785_v51, %v656_v21  ;;  %v3236_v4 = vadd.f32 %v776_v57, %v647_v56  ;;  %v2203_v56 = vld [vmem:[%s4250_s0 + $0x140] sm:$0xff]  ;;  %v317_v31 = vmul.f32 %v2187_v11, %v4337_v14  ;;  %v2242_v57 = vld [vmem:[%s4250_s0 + $0x278] sm:$0xff] }
 0x135   :  { %v3240_v19 = vadd.f32 %v786_v18, %v3152_v58  ;;  %v2232_v18 = vld [vmem:[%s4250_s0 + $0x228] sm:$0xff]  ;;  %v2243_v11 = vld [vmem:[%s4250_s0 + $0x280] sm:$0xff] }
 0x137   :  { %2397 = vset.pattern.permute.xlu2 %v4335_v55  ;;  %v730_v58 = vpop.permute.xlu2 %729  ;;  %2396 = vset.pattern.permute.xlu1 %v4276_v25  ;;  %v3255_v6 = vpop.permute.xlu1 %693 }
 0x138   :  { %v756_v30 = vmul.f32 %v2239_v20, %v730_v58  ;;  %v734_v41 = vpop.permute.xlu0 %733  ;;  %1293 = vperm.xlu2 %2397, %v4330_v35   ;;  %1148 = vperm.xlu1 %2396, %v4330_v35   ;;  %v201_v35 = vmul.f32 %v169_v22, %v169_v22  ;;  %v4341_v22 = vld [vmem:[#allocation27_spill] sm:$0xff] }
 0x139   :  { %v757_v47 = vmul.f32 %v2240_v42, %v734_v41  ;;  %v175_v42 = vmul.f32 %v4340_v53, %v79_v44  ;;  %v462_v24 = vmul.f32 %v2203_v56, %v4341_v22  ;;  %v2190_v41 = vld [vmem:[%s4250_s0 + $0xd8] sm:$0xff]  ;;  %v2443_v44 = vld [vmem:[%s4252_s2 + $0x40] sm:$0xff] }
 0x13a   :  { %v3264_v45 = vadd.f32 %v756_v30, %v3046_v13  ;;  %v788_v38 = vmul.f32 %v756_v30, %v756_v30  ;;  %2416 = vset.pattern.permute.xlu0 %v2524_v17  ;;  %v76_v13 = vld [vmem:[%s4250_s0 + $0x40] sm:$0xff] }
 0x13b   :  { %v3271_v61 = vadd.f32 %v757_v47, %v3185_v1  ;;  %v789_v54 = vmul.f32 %v757_v47, %v757_v47  ;;  %1418 = vperm.xlu0 %2416, %v2615_v5   ;;  %v362_v1 = vadd.f32 %v346_v9, %v201_v35  ;;  %v636_v5 = vmul.f32 %v604_v40, %v604_v40  ;;  %v2442_v47 = vld [vmem:[%s4252_s2] sm:$0xff] }
 0x13c   :  { %v3284_v21 = vadd.f32 %v788_v38, %v3063_v34  ;;  %v2183_v34 = vld [vmem:[%s4250_s0 + $0xa0] sm:$0xff]  ;;  %v172_v20 = vmul.f32 %v4339_v16, %v76_v13  ;;  %v620_v9 = vadd.f32 %v604_v40, %v475_v46  ;;  %v349_v35 = vmul.f32 %v317_v31, %v317_v31 }
 0x13d   :  { %v3288_v51 = vadd.f32 %v789_v54, %v3190_v2  ;;  %v2219_v2 = vld [vmem:[%s4250_s0 + $0x1c0] sm:$0xff]  ;;  %v507_v39 = vadd.f32 %v491_v26, %v362_v1  ;;  %v4343_v54 = vld [vmem:[#allocation33_spill] sm:$0xff] }
 0x13e   :  { %v4342_v38 = vld [vmem:[#allocation19_spill] sm:$0xff]  ;;  %v607_v13 = vmul.f32 %v2219_v2, %v4343_v54  ;;  %v200_v2 = vmul.f32 %v168_v37, %v168_v37  ;;  %v333_v16 = vadd.f32 %v317_v31, %v172_v20 }
 0x13f   :  { %v742_v58 = vpop.permute.xlu2 %741  ;;  %v702_v30 = vpop.permute.xlu1 %701  ;;  %v313_v49 = vmul.f32 %v2183_v34, %v4342_v38  ;;  %v652_v26 = vadd.f32 %v636_v5, %v507_v39  ;;  %v494_v34 = vmul.f32 %v462_v24, %v462_v24  ;;  %v4345_v5 = vld [vmem:[#allocation13_spill] sm:$0xff]  ;;  %v2199_v53 = vld [vmem:[%s4250_s0 + $0x120] sm:$0xff] }
 0x140   :  { %v759_v12 = vmul.f32 %v2242_v57, %v742_v58  ;;  %v749_v32 = vmul.f32 %v2232_v18, %v702_v30  ;;  %1261 = vperm.xlu2 %2397, %v2442_v47   ;;  %2398 = vset.pattern.permute.xlu1 %v2524_v17  ;;  %v204_v57 = vmul.f32 %v172_v20, %v172_v20  ;;  %v4344_v18 = vld [vmem:[#allocation23_spill] sm:$0xff]  ;;  %v2245_v38 = vld [vmem:[%s4250_s0 + $0x290] sm:$0xff] }
 0x141   :  { %v827_v40 = vpop.permute.xlu0 %826  ;;  %1438 = vperm.xlu1 %2398, %v2443_v44   ;;  %v320_v8 = vmul.f32 %v2190_v41, %v4344_v18  ;;  %v2206_v58 = vld [vmem:[%s4250_s0 + $0x158] sm:$0xff]  ;;  %v639_v30 = vmul.f32 %v607_v13, %v607_v13  ;;  %v2235_v31 = vld [vmem:[%s4250_s0 + $0x240] sm:$0xff]  ;;  %v207_v20 = vmul.f32 %v175_v42, %v175_v42 }
 0x142   :  { %v3322_v60 = vadd.f32 %v759_v12, %v3094_v23  ;;  %v791_v56 = vmul.f32 %v759_v12, %v759_v12  ;;  %v765_v1 = vadd.f32 %v749_v32, %v620_v9  ;;  %v781_v14 = vmul.f32 %v749_v32, %v749_v32 }
 0x143   :  { %v889_v46 = vmul.f32 %v2243_v11, %v827_v40  ;;  %1458 = vperm.xlu0 %2416, %v4345_v5   ;;  %v365_v22 = vadd.f32 %v349_v35, %v204_v57  ;;  %v329_v12 = vadd.f32 %v313_v49, %v168_v37  ;;  %v345_v32 = vmul.f32 %v313_v49, %v313_v49  ;;  %v2215_v11 = vld [vmem:[%s4250_s0 + $0x1a0] sm:$0xff]  ;;  %v2222_v40 = vld [vmem:[%s4250_s0 + $0x1d8] sm:$0xff]  ;;  %v2248_v49 = vld [vmem:[%s4250_s0 + $0x2a8] sm:$0xff] }
 0x144   :  { %v3330_v39 = vadd.f32 %v791_v56, %v3107_v36  ;;  %v797_v23 = vadd.f32 %v781_v14, %v652_v26  ;;  %v478_v36 = vadd.f32 %v462_v24, %v333_v16  ;;  %v336_v35 = vadd.f32 %v320_v8, %v175_v42  ;;  %v4347_v56 = vld [vmem:[#allocation28_spill] sm:$0xff] }
 0x145   :  { %v3336_v41 = vadd.f32 %v889_v46, %v3222_v33  ;;  %v921_v9 = vmul.f32 %v889_v46, %v889_v46  ;;  %v4346_v33 = vld [vmem:[#allocation24_spill] sm:$0xff]  ;;  %v510_v54 = vadd.f32 %v494_v34, %v365_v22  ;;  %v352_v44 = vmul.f32 %v320_v8, %v320_v8 }
 0x146   :  { %v458_v26 = vmul.f32 %v2199_v53, %v4346_v33  ;;  %v465_v14 = vmul.f32 %v2206_v58, %v4347_v56  ;;  %v623_v57 = vadd.f32 %v607_v13, %v478_v36  ;;  %v2231_v42 = vld [vmem:[%s4250_s0 + $0x220] sm:$0xff] }
 0x147   :  { %v3352_v37 = vadd.f32 %v921_v9, %v3236_v4  ;;  %v714_v24 = vpop.permute.xlu1 %713  ;;  %v655_v46 = vadd.f32 %v639_v30, %v510_v54  ;;  %v4348_v4 = vld [vmem:[#allocation44_spill] sm:$0xff]  ;;  %v748_v30 = vmul.f32 %v2231_v42, %v3132_v43 }
 0x148   :  { %v752_v18 = vmul.f32 %v2235_v31, %v714_v24  ;;  %2400 = vset.pattern.permute.xlu2 %v2524_v17  ;;  %v835_v34 = vpop.permute.xlu2 %834  ;;  %v603_v5 = vmul.f32 %v2215_v11, %v4348_v4  ;;  %v4349_v8 = vld [vmem:[#allocation36_spill] sm:$0xff]  ;;  %v490_v36 = vmul.f32 %v458_v26, %v458_v26  ;;  %v474_v43 = vadd.f32 %v458_v26, %v329_v12 }
 0x149   :  { %v891_v16 = vmul.f32 %v2245_v38, %v835_v34  ;;  %v847_v53 = vpop.permute.xlu0 %846  ;;  %1406 = vperm.xlu2 %2400, %v2442_v47   ;;  %2399 = vset.pattern.permute.xlu1 %v4276_v25  ;;  %v610_v22 = vmul.f32 %v2222_v40, %v4349_v8  ;;  %v2444_v31 = vld [vmem:[%s4252_s2 + $0x48] sm:$0xff]  ;;  %v497_v47 = vmul.f32 %v465_v14, %v465_v14  ;;  %v3378_v24 = vld [vmem:[%s4252_s2 + $0x20] sm:$0xff] }
 0x14a   :  { %v768_v58 = vadd.f32 %v752_v18, %v623_v57  ;;  %v784_v13 = vmul.f32 %v752_v18, %v752_v18  ;;  %v894_v9 = vmul.f32 %v2248_v49, %v847_v53  ;;  %1152 = vperm.xlu1 %2399, %v2444_v31   ;;  %v361_v49 = vadd.f32 %v345_v32, %v200_v2  ;;  %v2238_v57 = vld [vmem:[%s4250_s0 + $0x258] sm:$0xff] }
 0x14b   :  { %v3370_v11 = vadd.f32 %v891_v16, %v3154_v15  ;;  %v923_v38 = vmul.f32 %v891_v16, %v891_v16  ;;  %2423 = vset.pattern.permute.xlu0 %v4335_v55  ;;  %v635_v56 = vmul.f32 %v603_v5, %v603_v5  ;;  %v481_v42 = vadd.f32 %v465_v14, %v336_v35 }
 0x14c   :  { %v800_v33 = vadd.f32 %v784_v13, %v655_v46  ;;  %v3373_v54 = vadd.f32 %v894_v9, %v765_v1  ;;  %v926_v40 = vmul.f32 %v894_v9, %v894_v9  ;;  %1277 = vperm.xlu0 %2423, %v3378_v24   ;;  %v368_v1 = vadd.f32 %v352_v44, %v207_v20  ;;  %v2247_v46 = vld [vmem:[%s4250_s0 + $0x2a0] sm:$0xff] }
 0x14d   :  { %v3382_v15 = vadd.f32 %v923_v38, %v3170_v52  ;;  %v642_v18 = vmul.f32 %v610_v22, %v610_v22  ;;  %v506_v4 = vadd.f32 %v490_v36, %v361_v49  ;;  %v619_v2 = vadd.f32 %v603_v5, %v474_v43  ;;  %v2251_v52 = vld [vmem:[%s4250_s0 + $0x2c0] sm:$0xff]  ;;  %v3398_v5 = vld [vmem:[%s4252_s2 + $0x8] sm:$0xff] }
 0x14e   :  { %v3387_v34 = vadd.f32 %v926_v40, %v797_v23  ;;  %v780_v12 = vmul.f32 %v748_v30, %v748_v30  ;;  %v513_v26 = vadd.f32 %v497_v47, %v368_v1  ;;  %v626_v16 = vadd.f32 %v610_v22, %v481_v42  ;;  %v2254_v42 = vld [vmem:[%s4250_s0 + $0x2d8] sm:$0xff] }
 0x14f   :  { %v726_v32 = vpop.permute.xlu1 %725  ;;  %v651_v35 = vadd.f32 %v635_v56, %v506_v4  ;;  %v764_v44 = vadd.f32 %v748_v30, %v619_v2  ;;  %v2241_v56 = vld [vmem:[%s4250_s0 + $0x270] sm:$0xff]  ;;  %v2182_v4 = vld [vmem:[%s4250_s0 + $0x98] sm:$0xff] }
 0x150   :  { %v755_v53 = vmul.f32 %v2238_v57, %v726_v32  ;;  %v843_v20 = vpop.permute.xlu2 %842  ;;  %v658_v8 = vadd.f32 %v642_v18, %v513_v26 }
 0x151   :  { %v893_v23 = vmul.f32 %v2247_v46, %v843_v20  ;;  %v859_v14 = vpop.permute.xlu0 %858  ;;  %1442 = vperm.xlu2 %2400, %v2444_v31   ;;  %v796_v38 = vadd.f32 %v780_v12, %v651_v35  ;;  %v3408_v31 = vld [vmem:[%s4252_s2 + $0x70] sm:$0xff] }
 0x152   :  { %v771_v13 = vadd.f32 %v755_v53, %v626_v16  ;;  %v787_v9 = vmul.f32 %v755_v53, %v755_v53  ;;  %v897_v36 = vmul.f32 %v2251_v52, %v859_v14  ;;  %1120 = vperm.xlu1 %2399, %v3398_v5   ;;  %v2198_v16 = vld [vmem:[%s4250_s0 + $0x118] sm:$0xff]  ;;  %v3443_v35 = vld [vmem:[%s4252_s2 + $0x50] sm:$0xff] }
 0x153   :  { %v3401_v22 = vadd.f32 %v893_v23, %v764_v44  ;;  %v925_v47 = vmul.f32 %v893_v23, %v893_v23 }
 0x154   :  { %v803_v40 = vadd.f32 %v787_v9, %v658_v8  ;;  %v3403_v30 = vadd.f32 %v897_v36, %v768_v58  ;;  %v929_v49 = vmul.f32 %v897_v36, %v897_v36  ;;  %1317 = vperm.xlu0 %2423, %v3408_v31   ;;  %v2250_v58 = vld [vmem:[%s4250_s0 + $0x2b8] sm:$0xff] }
 0x155   :  { %v3411_v43 = vadd.f32 %v925_v47, %v796_v38  ;;  %v4351_v9 = vld [vmem:[#allocation18_spill] sm:$0xff] }
 0x156   :  { %v3416_v57 = vadd.f32 %v929_v49, %v800_v33  ;;  %v71_v33 = vld [vmem:[%s4250_s0 + $0x18] sm:$0xff] }
 0x157   :  { %v738_v1 = vpop.permute.xlu1 %737  ;;  %v2214_v36 = vld [vmem:[%s4250_s0 + $0x198] sm:$0xff] }
 0x158   :  { %v758_v18 = vmul.f32 %v2241_v56, %v738_v1  ;;  %v855_v46 = vpop.permute.xlu2 %854  ;;  %v3461_v47 = vld [vmem:[%s4252_s2 + $0x78] sm:$0xff]  ;;  %v2253_v56 = vld [vmem:[%s4250_s0 + $0x2d0] sm:$0xff] }
 0x159   :  { %v896_v2 = vmul.f32 %v2250_v58, %v855_v46  ;;  %v871_v12 = vpop.permute.xlu0 %870  ;;  %2404 = vset.pattern.permute.xlu2 %v4335_v55  ;;  %v2230_v58 = vld [vmem:[%s4250_s0 + $0x218] sm:$0xff]  ;;  %v2257_v1 = vld [vmem:[%s4250_s0 + $0x2f0] sm:$0xff] }
 0x15a   :  { %v774_v32 = vadd.f32 %v758_v18, %v3039_v59  ;;  %v790_v52 = vmul.f32 %v758_v18, %v758_v18  ;;  %v900_v26 = vmul.f32 %v2254_v42, %v871_v12  ;;  %1265 = vperm.xlu2 %2404, %v3398_v5   ;;  %2403 = vset.pattern.permute.xlu1 %v4315_v50  ;;  %v4350_v59 = vld [vmem:[#allocation20_spill] sm:$0xff]  ;;  %v4353_v18 = vld [vmem:[#allocation31_spill] sm:$0xff] }
 0x15b   :  { %v3438_v53 = vadd.f32 %v896_v2, %v3192_v63  ;;  %v928_v20 = vmul.f32 %v896_v2, %v896_v2  ;;  %1011 = vperm.xlu1 %2403, %v3443_v35   ;;  %v312_v44 = vmul.f32 %v2182_v4, %v4350_v59  ;;  %v167_v63 = vmul.f32 %v4351_v9, %v71_v33 }
 0x15c   :  { %v806_v23 = vadd.f32 %v790_v52, %v3049_v62  ;;  %v3448_v14 = vadd.f32 %v900_v26, %v771_v13  ;;  %v932_v8 = vmul.f32 %v900_v26, %v900_v26  ;;  %2430 = vset.pattern.permute.xlu0 %v4276_v25  ;;  %v4352_v62 = vld [vmem:[#allocation26_spill] sm:$0xff] }
 0x15d   :  { %v3456_v38 = vadd.f32 %v928_v20, %v3203_v10  ;;  %1176 = vperm.xlu0 %2430, %v3461_v47   ;;  %v457_v13 = vmul.f32 %v2198_v16, %v4352_v62  ;;  %v2244_v10 = vld [vmem:[%s4250_s0 + $0x288] sm:$0xff]  ;;  %v344_v42 = vmul.f32 %v312_v44, %v312_v44  ;;  %v199_v2 = vmul.f32 %v167_v63, %v167_v63 }
 0x15e   :  { %v3465_v49 = vadd.f32 %v932_v8, %v803_v40  ;;  %v602_v40 = vmul.f32 %v2214_v36, %v4353_v18  ;;  %v328_v26 = vadd.f32 %v312_v44, %v167_v63  ;;  %v747_v20 = vmul.f32 %v2230_v58, %v3255_v6 }
 0x15f   :  { %v489_v16 = vmul.f32 %v457_v13, %v457_v13  ;;  %v360_v18 = vadd.f32 %v344_v42, %v199_v2 }
 0x160   :  { %v867_v46 = vpop.permute.xlu2 %866  ;;  %v831_v4 = vpop.permute.xlu1 %830  ;;  %v473_v6 = vadd.f32 %v457_v13, %v328_v26 }
 0x161   :  { %v899_v12 = vmul.f32 %v2253_v56, %v867_v46  ;;  %v890_v33 = vmul.f32 %v2244_v10, %v831_v4  ;;  %v883_v52 = vpop.permute.xlu0 %882  ;;  %v634_v56 = vmul.f32 %v602_v40, %v602_v40  ;;  %v505_v58 = vadd.f32 %v489_v16, %v360_v18 }
 0x162   :  { %v903_v59 = vmul.f32 %v2257_v1, %v883_v52  ;;  %1301 = vperm.xlu2 %2404, %v3443_v35  }
 0x163   :  { %v3483_v8 = vadd.f32 %v899_v12, %v3226_v48  ;;  %v931_v9 = vmul.f32 %v899_v12, %v899_v12  ;;  %v906_v62 = vadd.f32 %v890_v33, %v3096_v29  ;;  %v922_v36 = vmul.f32 %v890_v33, %v890_v33  ;;  %2405 = vset.pattern.permute.xlu1 %v2524_v17 }
 0x164   :  { %v3487_v10 = vadd.f32 %v903_v59, %v774_v32  ;;  %v935_v44 = vmul.f32 %v903_v59, %v903_v59  ;;  %1410 = vperm.xlu1 %2405, %v3398_v5   ;;  %v779_v29 = vmul.f32 %v747_v20, %v747_v20  ;;  %v2256_v32 = vld [vmem:[%s4250_s0 + $0x2e8] sm:$0xff]  ;;  %v2246_v5 = vld [vmem:[%s4250_s0 + $0x298] sm:$0xff]  ;;  %v650_v13 = vadd.f32 %v634_v56, %v505_v58 }
 0x165   :  { %v3491_v63 = vadd.f32 %v931_v9, %v3240_v19  ;;  %v938_v48 = vadd.f32 %v922_v36, %v3109_v0  ;;  %2434 = vset.pattern.permute.xlu0 %v4335_v55  ;;  %v3506_v19 = vld [vmem:[%s4252_s2 + $0x38] sm:$0xff]  ;;  %v618_v0 = vadd.f32 %v602_v40, %v473_v6  ;;  %v2451_v9 = vld [vmem:[%s4252_s2 + $0x10] sm:$0xff] }
 0x166   :  { %v3495_v1 = vadd.f32 %v935_v44, %v806_v23  ;;  %1289 = vperm.xlu0 %2434, %v3506_v19   ;;  %v795_v12 = vadd.f32 %v779_v29, %v650_v13  ;;  %v2452_v29 = vld [vmem:[%s4252_s2 + $0x58] sm:$0xff] }
 0x167   :  { %v763_v46 = vadd.f32 %v747_v20, %v618_v0 }
 0x168   :  { %v879_v42 = vpop.permute.xlu2 %878  ;;  %v839_v23 = vpop.permute.xlu1 %838 }
 0x169   :  { %v902_v4 = vmul.f32 %v2256_v32, %v879_v42  ;;  %v892_v2 = vmul.f32 %v2246_v5, %v839_v23 }
 0x16a   :  { %2407 = vset.pattern.permute.xlu2 %v2524_v17  ;;  %v3510_v33 = vpop.permute.xlu0 %1297 }
 0x16b   :  { %v3513_v52 = vadd.f32 %v902_v4, %v3271_v61  ;;  %v934_v26 = vmul.f32 %v902_v4, %v902_v4  ;;  %v908_v16 = vadd.f32 %v892_v2, %v763_v46  ;;  %v924_v59 = vmul.f32 %v892_v2, %v892_v2  ;;  %1446 = vperm.xlu2 %2407, %v3443_v35   ;;  %v2249_v61 = vld [vmem:[%s4250_s0 + $0x2b0] sm:$0xff] }
 0x16c   :  { %2406 = vset.pattern.permute.xlu1 %v4276_v25  ;;  %v2265_v46 = vld [vmem:[%s4250_s0 + $0x330] sm:$0xff] }
 0x16d   :  { %v3518_v40 = vadd.f32 %v934_v26, %v3288_v51  ;;  %v940_v20 = vadd.f32 %v924_v59, %v795_v12  ;;  %1124 = vperm.xlu1 %2406, %v2451_v9   ;;  %v2260_v51 = vld [vmem:[%s4250_s0 + $0x308] sm:$0xff] }
 0x16e   :  { %2436 = vset.pattern.permute.xlu0 %v2524_v17 }
 0x170   :  { %v851_v36 = vpop.permute.xlu1 %850 }
 0x171   :  { %v895_v18 = vmul.f32 %v2249_v61, %v851_v36  ;;  %v3527_v35 = vpop.permute.xlu2 %971  ;;  %v2255_v61 = vld [vmem:[%s4250_s0 + $0x2e0] sm:$0xff] }
 0x173   :  { %v911_v56 = vadd.f32 %v895_v18, %v3187_v3  ;;  %v927_v44 = vmul.f32 %v895_v18, %v895_v18  ;;  %v976_v6 = vpop.permute.xlu0 %975  ;;  %2410 = vset.pattern.permute.xlu2 %v4276_v25  ;;  %v2262_v3 = vld [vmem:[%s4250_s0 + $0x318] sm:$0xff] }
 0x174   :  { %v1035_v58 = vmul.f32 %v2260_v51, %v976_v6  ;;  %1160 = vperm.xlu2 %2410, %v2452_v29  }
 0x175   :  { %v943_v32 = vadd.f32 %v927_v44, %v3200_v7  ;;  %2409 = vset.pattern.permute.xlu1 %v4335_v55 }
 0x176   :  { %v3539_v5 = vadd.f32 %v1035_v58, %v906_v62  ;;  %v1067_v0 = vmul.f32 %v1035_v58, %v1035_v58  ;;  %1269 = vperm.xlu1 %2409, %v2451_v9  }
 0x178   :  { %v3544_v13 = vadd.f32 %v1067_v0, %v938_v48  ;;  %v3546_v42 = vpop.permute.xlu1 %862 }
 0x179   :  { %v984_v23 = vpop.permute.xlu2 %983 }
 0x17a   :  { %v1037_v7 = vmul.f32 %v2262_v3, %v984_v23 }
 0x17b   :  { %v996_v4 = vpop.permute.xlu0 %995 }
 0x17c   :  { %v3551_v2 = vadd.f32 %v1037_v7, %v908_v16  ;;  %v1069_v62 = vmul.f32 %v1037_v7, %v1037_v7  ;;  %v1040_v12 = vmul.f32 %v2265_v46, %v996_v4  ;;  %2412 = vset.pattern.permute.xlu2 %v4335_v55  ;;  %v2264_v16 = vld [vmem:[%s4250_s0 + $0x328] sm:$0xff] }
 0x17d   :  { %1305 = vperm.xlu2 %2412, %v2452_v29  }
 0x17e   :  { %v3554_v26 = vadd.f32 %v1069_v62, %v940_v20  ;;  %v3556_v48 = vadd.f32 %v1040_v12, %v911_v56  ;;  %v1072_v59 = vmul.f32 %v1040_v12, %v1040_v12  ;;  %2411 = vset.pattern.permute.xlu1 %v2524_v17 }
 0x17f   :  { %1414 = vperm.xlu1 %2411, %v2451_v9  }
 0x180   :  { %v3565_v36 = vadd.f32 %v1072_v59, %v943_v32  ;;  %v875_v18 = vpop.permute.xlu1 %874  ;;  %v1624_v59 = vld [vmem:[%s4255_s5 + $0x18] sm:$0xff] }
 0x181   :  { %v901_v51 = vmul.f32 %v2255_v61, %v875_v18  ;;  %v992_v20 = vpop.permute.xlu2 %991  ;;  %1690 = vmatpush.msra.mxu0 %v1624_v59  ;;  %2356 = vmatpush.msra.mxu2 %v1624_v59 }
 0x182   :  { %v1039_v44 = vmul.f32 %v2264_v16, %v992_v20 }
 0x183   :  { %v3568_v56 = vadd.f32 %v901_v51, %v3264_v45  ;;  %v933_v6 = vmul.f32 %v901_v51, %v901_v51  ;;  %v3570_v58 = vpop.permute.xlu0 %1007  ;;  %v3585_v45 = vld [vmem:[%s4252_s2 + $0x60] sm:$0xff]  ;;  %v2454_v51 = vld [vmem:[%s4252_s2 + $0x18] sm:$0xff] }
 0x184   :  { %v3573_v0 = vadd.f32 %v1039_v44, %v3373_v54  ;;  %v1071_v9 = vmul.f32 %v1039_v44, %v1039_v44  ;;  %v2258_v54 = vld [vmem:[%s4250_s0 + $0x2f8] sm:$0xff]  ;;  %v1621_v44 = vld [vmem:[%s4255_s5] sm:$0xff] }
 0x185   :  { %v3576_v3 = vadd.f32 %v933_v6, %v3284_v21  ;;  %2413 = vset.pattern.permute.xlu2 %v4315_v50 }
 0x186   :  { %v3580_v32 = vadd.f32 %v1071_v9, %v3387_v34  ;;  %1019 = vperm.xlu2 %2413, %v3585_v45   ;;  %v2270_v34 = vld [vmem:[%s4250_s0 + $0x358] sm:$0xff] }
 0x187   :  { %1450 = vperm.xlu1 %2411, %v2452_v29  }
 0x188   :  { %v887_v23 = vpop.permute.xlu1 %886 }
 0x189   :  { %v904_v21 = vmul.f32 %v2258_v54, %v887_v23  ;;  %v3591_v46 = vpop.permute.xlu2 %1003  ;;  %v2259_v23 = vld [vmem:[%s4250_s0 + $0x300] sm:$0xff] }
 0x18b   :  { %v3597_v7 = vadd.f32 %v904_v21, %v3322_v60  ;;  %v936_v4 = vmul.f32 %v904_v21, %v904_v21  ;;  %v1016_v62 = vpop.permute.xlu0 %1015  ;;  %v1623_v60 = vld [vmem:[%s4255_s5 + $0x10] sm:$0xff] }
 0x18c   :  { %v1045_v12 = vmul.f32 %v2270_v34, %v1016_v62  ;;  %1691 = vmatpush.msra.mxu0 %v1623_v60  ;;  %2357 = vmatpush.msra.mxu2 %v1623_v60  ;;  %v2263_v34 = vld [vmem:[%s4250_s0 + $0x320] sm:$0xff]  ;;  %v1034_v62 = vmul.f32 %v2259_v23, %v3527_v35  ;;  %v2266_v35 = vld [vmem:[%s4250_s0 + $0x338] sm:$0xff] }
 0x18d   :  { %v3603_v29 = vadd.f32 %v936_v4, %v3330_v39  ;;  %v2261_v39 = vld [vmem:[%s4250_s0 + $0x310] sm:$0xff]  ;;  %v2291_v60 = vld [vmem:[%s4250_s0 + $0x400] sm:$0xff] }
 0x18e   :  { %v3606_v61 = vadd.f32 %v1045_v12, %v3448_v14  ;;  %v1077_v16 = vmul.f32 %v1045_v12, %v1045_v12  ;;  %2415 = vset.pattern.permute.xlu2 %v4276_v25  ;;  %v1622_v14 = vld [vmem:[%s4255_s5 + $0x8] sm:$0xff] }
 0x18f   :  { %1164 = vperm.xlu2 %2415, %v3585_v45   ;;  %2414 = vset.pattern.permute.xlu1 %v4335_v55 }
 0x190   :  { %v3621_v18 = vadd.f32 %v1077_v16, %v3465_v49  ;;  %1273 = vperm.xlu1 %2414, %v2454_v51   ;;  %1692 = vmatpush.msra.mxu0 %v1622_v14  ;;  %v1066_v51 = vmul.f32 %v1034_v62, %v1034_v62 }
 0x191   :  { %v980_v20 = vpop.permute.xlu1 %979  ;;  %2358 = vmatpush.msra.mxu2 %v1622_v14 }
 0x192   :  { %v1036_v6 = vmul.f32 %v2261_v39, %v980_v20  ;;  %v3629_v9 = vpop.permute.xlu2 %1293  ;;  %1693 = vmatpush.msra.mxu0 %v1621_v44 }
 0x193   :  { %2359 = vmatpush.msra.mxu2 %v1621_v44 }
 0x194   :  { %v3632_v49 = vadd.f32 %v1036_v6, %v3370_v11  ;;  %v1068_v54 = vmul.f32 %v1036_v6, %v1036_v6  ;;  %v2275_v11 = vld [vmem:[%s4250_s0 + $0x380] sm:$0xff]  ;;  %v1117_v4 = vpop.permute.xlu0 %1116 }
 0x196   :  { %v3638_v21 = vadd.f32 %v1068_v54, %v3382_v15  ;;  %v1179_v15 = vmul.f32 %v2275_v11, %v1117_v4  ;;  %v1050_v54 = vadd.f32 %v1034_v62, %v3336_v41 }
 0x197   :  { %1132 = vperm.xlu2 %2415, %v3378_v24  }
 0x198   :  { %1309 = vperm.xlu1 %2414, %v3585_v45   ;;  %v1211_v6 = vmul.f32 %v1179_v15, %v1179_v15  ;;  %v1195_v11 = vadd.f32 %v1179_v15, %v1050_v54 }
 0x199   :  { %v988_v12 = vpop.permute.xlu1 %987 }
 0x19a   :  { %v1038_v59 = vmul.f32 %v2263_v34, %v988_v12  ;;  %v1262_v16 = vpop.permute.xlu2 %1261  ;;  %v2307_v34 = vld [vmem:[%s4250_s0 + $0x480] sm:$0xff] }
 0x19b   :  { %v1324_v44 = vmul.f32 %v2291_v60, %v1262_v16 }
 0x19c   :  { %v3653_v39 = vadd.f32 %v1038_v59, %v3401_v22  ;;  %v1070_v14 = vmul.f32 %v1038_v59, %v1038_v59  ;;  %v2455_v22 = vld [vmem:[%s4252_s2 + $0x68] sm:$0xff] }
 0x19d   :  { %v1356_v4 = vmul.f32 %v1324_v44, %v1324_v44  ;;  %v1340_v59 = vadd.f32 %v1324_v44, %v1195_v11  ;;  %v4354_v44 = vmov 7  }
 0x19e   :  { %v3656_v20 = vadd.f32 %v1070_v14, %v3411_v43  ;;  %v1082_v43 = vadd.f32 %v1066_v51, %v3352_v37  ;;  %v2267_v37 = vld [vmem:[%s4250_s0 + $0x340] sm:$0xff] }
 0x19f   :  { %2418 = vset.pattern.permute.xlu2 %v4315_v50 }
 0x1a0   :  { %1023 = vperm.xlu2 %2418, %v2455_v22   ;;  %2417 = vset.pattern.permute.xlu1 %v2524_v17  ;;  %v1227_v41 = vadd.f32 %v1211_v6, %v1082_v43 }
 0x1a1   :  { %1454 = vperm.xlu1 %2417, %v3585_v45   ;;  %v1000_v23 = vpop.permute.xlu1 %999 }
 0x1a2   :  { %v1041_v12 = vmul.f32 %v2266_v35, %v1000_v23  ;;  %v1372_v45 = vadd.f32 %v1356_v4, %v1227_v41  ;;  %v1042_v35 = vmul.f32 %v2267_v37, %v3591_v46  ;;  %v3691_v23 = vld [vmem:[%s4253_s3] ss:$0 sm:$0xff] }
 0x1a3   :  { %v1407_v62 = vpop.permute.xlu2 %1406 }
 0x1a4   :  { %v3673_v16 = vadd.f32 %v1041_v12, %v3438_v53  ;;  %v1073_v60 = vmul.f32 %v1041_v12, %v1041_v12  ;;  %v1469_v14 = vmul.f32 %v2307_v34, %v1407_v62  ;;  %v2283_v53 = vld [vmem:[%s4250_s0 + $0x3c0] sm:$0xff]  ;;  %v1074_v11 = vmul.f32 %v1042_v35, %v1042_v35 }
 0x1a5   :  { %v1058_v12 = vadd.f32 %v1042_v35, %v3403_v30  ;;  %v2252_v30 = vld [vmem:[%s4250_s0 + $0x2c8] sm:$0xff] }
 0x1a6   :  { %v3679_v51 = vadd.f32 %v1073_v60, %v3456_v38  ;;  %v1485_v25 = vadd.f32 %v1469_v14, %v1340_v59  ;;  %v1501_v15 = vmul.f32 %v1469_v14, %v1469_v14  ;;  %v1090_v60 = vadd.f32 %v1074_v11, %v3416_v57  ;;  %v2456_v57 = vld [vmem:[%s4252_s2 + $0x28] sm:$0xff] }
 0x1a8   :  { %v1517_v6 = vadd.f32 %v1501_v15, %v1372_v45  ;;  %v1533_v54 = vmul.f32 %v1485_v25, %v1485_v25  ;;  %2420 = vset.pattern.permute.xlu2 %v2524_v17  ;;  %v2299_v25 = vld [vmem:[%s4250_s0 + $0x440] sm:$0xff] }
 0x1a9   :  { %1422 = vperm.xlu2 %2420, %v3378_v24   ;;  %2419 = vset.pattern.permute.xlu1 %v4354_v44  ;;  %v3699_v24 = vld [vmem:[%s4254_s4] ss:$0 sm:$0xff]  ;;  %v1332_v41 = vmul.f32 %v2299_v25, %v3629_v9 }
 0x1aa   :  { %v1549_v43 = vsub.f32 %v1533_v54, %v1517_v6  ;;  %1168 = vperm.xlu1 %2419, %v2455_v22   ;;  %v1149_v38 = vpop.permute.xlu1 %1148  ;;  %v2315_v45 = vld [vmem:[%s4250_s0 + $0x4c0] sm:$0xff]  ;;  %v2268_v6 = vld [vmem:[%s4250_s0 + $0x348] sm:$0xff] }
 0x1ab   :  { %v1187_v46 = vmul.f32 %v2283_v53, %v1149_v38  ;;  %v1443_v34 = vpop.permute.xlu2 %1442  ;;  %v1364_v9 = vmul.f32 %v1332_v41, %v1332_v41  ;;  %v898_v38 = vmul.f32 %v2252_v30, %v3546_v42  ;;  %v2284_v42 = vld [vmem:[%s4250_s0 + $0x3c8] sm:$0xff] }
 0x1ac   :  { %v1565_v4 = vmul.f32 0.5, %v1549_v43 }
 0x1ad   :  { %v1219_v62 = vmul.f32 %v1187_v46, %v1187_v46  ;;  %v1203_v14 = vadd.f32 %v1187_v46, %v1058_v12 }
 0x1ae   :  { %v1585_v59 = vmul.f32 %v3691_v23, %v1565_v4  ;;  %v1043_v4 = vmul.f32 %v2268_v6, %v3570_v58 }
 0x1af   :  { %v1235_v15 = vadd.f32 %v1219_v62, %v1090_v60  ;;  %v1348_v54 = vadd.f32 %v1332_v41, %v1203_v14  ;;  %v2316_v41 = vld [vmem:[%s4250_s0 + $0x4c8] sm:$0xff]  ;;  %v914_v14 = vadd.f32 %v898_v38, %v3220_v28 }
 0x1b0   :  { %v1605_v37 = vadd.f32 %v3699_v24, %v1585_v59  ;;  %v930_v59 = vmul.f32 %v898_v38, %v898_v38  ;;  %v1478_v6 = vmul.f32 %v2316_v41, %v1443_v34 }
 0x1b1   :  { %2422 = vset.pattern.permute.xlu2 %v4354_v44  ;;  %v1380_v25 = vadd.f32 %v1364_v9, %v1235_v15 }
 0x1b2   :  { %1136 = vperm.xlu2 %2422, %v2456_v57   ;;  %2421 = vset.pattern.permute.xlu1 %v4335_v55  ;;  %v946_v15 = vadd.f32 %v930_v59, %v3234_v27 }
 0x1b3   :  { %2323 = vmatmul.msk.f32.vlgmr.msra.gmra.mxu0 %vm1629_vm0, %v1605_v37  ;;  %1313 = vperm.xlu1 %2421, %v2455_v22   ;;  %v1439_v35 = vpop.permute.xlu1 %1438  ;;  %v2300_v22 = vld [vmem:[%s4250_s0 + $0x448] sm:$0xff]  ;;  %v1075_v37 = vmul.f32 %v1043_v4, %v1043_v4 }
 0x1b4   :  { %v1477_v53 = vmul.f32 %v2315_v45, %v1439_v35  ;;  %v3721_v43 = vpop.permute.xlu2 %1265  ;;  %v1333_v58 = vmul.f32 %v2300_v22, %v3510_v33  ;;  %v1059_v35 = vadd.f32 %v1043_v4, %v914_v14  ;;  %v2276_v14 = vld [vmem:[%s4250_s0 + $0x388] sm:$0xff] }
 0x1b5   :  { %v1091_v33 = vadd.f32 %v1075_v37, %v946_v15  ;;  %v1157_v37 = vpop.permute.xlu0 %1156 }
 0x1b6   :  { %v1493_v46 = vadd.f32 %v1477_v53, %v1348_v54  ;;  %v1509_v11 = vmul.f32 %v1477_v53, %v1477_v53 }
 0x1b8   :  { %v1525_v12 = vadd.f32 %v1509_v11, %v1380_v25  ;;  %v1541_v62 = vmul.f32 %v1493_v46, %v1493_v46  ;;  %v1365_v25 = vmul.f32 %v1333_v58, %v1333_v58  ;;  %v1510_v11 = vmul.f32 %v1478_v6, %v1478_v6 }
 0x1ba   :  { %v1557_v60 = vsub.f32 %v1541_v62, %v1525_v12  ;;  %2425 = vset.pattern.permute.xlu2 %v4335_v55 }
 0x1bb   :  { %1281 = vperm.xlu2 %2425, %v2456_v57   ;;  %2424 = vset.pattern.permute.xlu1 %v4315_v50 }
 0x1bc   :  { %v1573_v45 = vmul.f32 0.5, %v1557_v60  ;;  %1027 = vperm.xlu1 %2424, %v3408_v31   ;;  %v1153_v30 = vpop.permute.xlu1 %1152  ;;  %v1302_v9 = vpop.permute.xlu2 %1301 }
 0x1bd   :  { %v1188_v54 = vmul.f32 %v2284_v42, %v1153_v30  ;;  %v2285_v42 = vld [vmem:[%s4250_s0 + $0x3d0] sm:$0xff] }
 0x1be   :  { %v1593_v53 = vmul.f32 %v3691_v23, %v1573_v45  ;;  %v2269_v45 = vld [vmem:[%s4250_s0 + $0x350] sm:$0xff]  ;;  %v1189_v15 = vmul.f32 %v2285_v42, %v1157_v37 }
 0x1bf   :  { %v1204_v46 = vadd.f32 %v1188_v54, %v1059_v35  ;;  %v1220_v28 = vmul.f32 %v1188_v54, %v1188_v54  ;;  %v2457_v54 = vld [vmem:[%s4252_s2 + $0x30] sm:$0xff] }
 0x1c0   :  { %v1613_v38 = vadd.f32 %v3699_v24, %v1593_v53 }
 0x1c1   :  { %v1236_v22 = vadd.f32 %v1220_v28, %v1091_v33  ;;  %v1349_v12 = vadd.f32 %v1333_v58, %v1204_v46  ;;  %v2292_v33 = vld [vmem:[%s4250_s0 + $0x408] sm:$0xff] }
 0x1c2   :  { %2331 = vmatmul.msk.f32.vlgmr.msra.gmra.mxu2 %vm1629_vm0, %v1613_v38  ;;  %v1221_v38 = vmul.f32 %v1189_v15, %v1189_v15 }
 0x1c3   :  { %v1381_v62 = vadd.f32 %v1365_v25, %v1236_v22  ;;  %v1494_v60 = vadd.f32 %v1478_v6, %v1349_v12  ;;  %2427 = vset.pattern.permute.xlu2 %v2524_v17  ;;  %v2317_v6 = vld [vmem:[%s4250_s0 + $0x4d0] sm:$0xff] }
 0x1c4   :  { %1426 = vperm.xlu2 %2427, %v2456_v57   ;;  %2426 = vset.pattern.permute.xlu1 %v4354_v44  ;;  %v1121_v27 = vpop.permute.xlu1 %1120  ;;  %v2301_v57 = vld [vmem:[%s4250_s0 + $0x450] sm:$0xff] }
 0x1c5   :  { %v1526_v34 = vadd.f32 %v1510_v11, %v1381_v62  ;;  %v1542_v4 = vmul.f32 %v1494_v60, %v1494_v60  ;;  %1172 = vperm.xlu1 %2426, %v3408_v31   ;;  %v1447_v59 = vpop.permute.xlu2 %1446  ;;  %v1180_v35 = vmul.f32 %v2276_v14, %v1121_v27  ;;  %v1334_v46 = vmul.f32 %v2301_v57, %v1302_v9  ;;  %v2308_v14 = vld [vmem:[%s4250_s0 + $0x488] sm:$0xff] }
 0x1c6   :  { %v1479_v11 = vmul.f32 %v2317_v6, %v1447_v59  ;;  %v1325_v62 = vmul.f32 %v2292_v33, %v3721_v43 }
 0x1c7   :  { %v1558_v41 = vsub.f32 %v1542_v4, %v1526_v34  ;;  %v1212_v60 = vmul.f32 %v1180_v35, %v1180_v35  ;;  %v1366_v27 = vmul.f32 %v1334_v46, %v1334_v46 }
 0x1c8   :  { %v1511_v9 = vmul.f32 %v1479_v11, %v1479_v11 }
 0x1c9   :  { %v1574_v58 = vmul.f32 0.5, %v1558_v41  ;;  %v1196_v41 = vadd.f32 %v1180_v35, %v3539_v5  ;;  %v1228_v59 = vadd.f32 %v1212_v60, %v3544_v13 }
 0x1cb   :  { %v1594_v30 = vmul.f32 %v3691_v23, %v1574_v58  ;;  %v1341_v37 = vadd.f32 %v1325_v62, %v1196_v41 }
 0x1cc   :  { %1462 = vperm.xlu2 %2427, %v3408_v31  }
 0x1cd   :  { %1140 = vperm.xlu1 %2426, %v2457_v54   ;;  %v1012_v53 = vpop.permute.xlu1 %1011  ;;  %v1614_v25 = vadd.f32 %v3699_v24, %v1594_v30 }
 0x1ce   :  { %v1044_v28 = vmul.f32 %v2269_v45, %v1012_v53  ;;  %v3770_v31 = vpop.permute.xlu2 %1160 }
 0x1cf   :  { %2332 = vmatmul.msk.f32.gmra.mxu2 %vm1629_vm0, %v1614_v25 }
 0x1d0   :  { %v1060_v22 = vadd.f32 %v1044_v28, %v3483_v8  ;;  %v1076_v12 = vmul.f32 %v1044_v28, %v1044_v28  ;;  %v1357_v8 = vmul.f32 %v1325_v62, %v1325_v62 }
 0x1d2   :  { %v1092_v34 = vadd.f32 %v1076_v12, %v3491_v63  ;;  %v1205_v4 = vadd.f32 %v1189_v15, %v1060_v22  ;;  %v1373_v35 = vadd.f32 %v1357_v8, %v1228_v59 }
 0x1d4   :  { %v1237_v42 = vadd.f32 %v1221_v38, %v1092_v34  ;;  %v1350_v58 = vadd.f32 %v1334_v46, %v1205_v4  ;;  %2429 = vset.pattern.permute.xlu2 %v4335_v55  ;;  %v2293_v4 = vld [vmem:[%s4250_s0 + $0x410] sm:$0xff] }
 0x1d5   :  { %2428 = vset.pattern.permute.xlu1 %v4315_v50  ;;  %1285 = vperm.xlu2 %2429, %v2457_v54   ;;  %v3785_v50 = vpop.permute.xlu0 %1128 }
 0x1d6   :  { %v1382_v43 = vadd.f32 %v1366_v27, %v1237_v42  ;;  %v1495_v63 = vadd.f32 %v1479_v11, %v1350_v58  ;;  %1031 = vperm.xlu1 %2428, %v3461_v47   ;;  %v1411_v5 = vpop.permute.xlu1 %1410 }
 0x1d7   :  { %v1470_v57 = vmul.f32 %v2308_v14, %v1411_v5  ;;  %v1306_v45 = vpop.permute.xlu2 %1305 }
 0x1d8   :  { %v1543_v30 = vmul.f32 %v1495_v63, %v1495_v63  ;;  %v1527_v15 = vadd.f32 %v1511_v9, %v1382_v43  ;;  %v2302_v63 = vld [vmem:[%s4250_s0 + $0x458] sm:$0xff] }
 0x1d9   :  { %v1486_v6 = vadd.f32 %v1470_v57, %v1341_v37  ;;  %v1502_v53 = vmul.f32 %v1470_v57, %v1470_v57 }
 0x1da   :  { %v1559_v55 = vsub.f32 %v1543_v30, %v1527_v15 }
 0x1db   :  { %v1518_v25 = vadd.f32 %v1502_v53, %v1373_v35  ;;  %v1534_v33 = vmul.f32 %v1486_v6, %v1486_v6 }
 0x1dc   :  { %v1575_v13 = vmul.f32 0.5, %v1559_v55 }
 0x1dd   :  { %v1550_v46 = vsub.f32 %v1534_v33, %v1518_v25  ;;  %1321 = vperm.xlu2 %2429, %v3461_v47   ;;  %v3797_v27 = vpop.permute.xlu0 %1418 }
 0x1de   :  { %2431 = vset.pattern.permute.xlu1 %v2524_v17  ;;  %v1595_v28 = vmul.f32 %v3691_v23, %v1575_v13 }
 0x1df   :  { %v1566_v38 = vmul.f32 0.5, %v1550_v46  ;;  %1430 = vperm.xlu1 %2431, %v2457_v54   ;;  %v1125_v11 = vpop.permute.xlu1 %1124  ;;  %v2277_v54 = vld [vmem:[%s4250_s0 + $0x390] sm:$0xff] }
 0x1e0   :  { %v3789_v22 = vpop.permute.xlu2 %1019  ;;  %v1615_v12 = vadd.f32 %v3699_v24, %v1595_v28  ;;  %v1181_v9 = vmul.f32 %v2277_v54, %v1125_v11  ;;  %v2278_v28 = vld [vmem:[%s4250_s0 + $0x398] sm:$0xff] }
 0x1e1   :  { %v1586_v62 = vmul.f32 %v3691_v23, %v1566_v38 }
 0x1e2   :  { %2333 = vmatmul.msk.f32.gmra.mxu2 %vm1629_vm0, %v1615_v12  ;;  %v1213_v58 = vmul.f32 %v1181_v9, %v1181_v9  ;;  %v1197_v14 = vadd.f32 %v1181_v9, %v3632_v49  ;;  %v1335_v49 = vmul.f32 %v2302_v63, %v1306_v45 }
 0x1e3   :  { %v1606_v60 = vadd.f32 %v3699_v24, %v1586_v62  ;;  %v2295_v62 = vld [vmem:[%s4250_s0 + $0x420] sm:$0xff] }
 0x1e4   :  { %v1229_v57 = vadd.f32 %v1213_v58, %v3638_v21  ;;  %v1367_v21 = vmul.f32 %v1335_v49, %v1335_v49  ;;  %v2310_v58 = vld [vmem:[%s4250_s0 + $0x498] sm:$0xff] }
 0x1e5   :  { %2324 = vmatmul.msk.f32.gmra.mxu0 %vm1629_vm0, %v1606_v60  ;;  %2433 = vset.pattern.permute.xlu2 %v2524_v17  ;;  %v3817_v59 = vpop.permute.xlu0 %1458 }
 0x1e6   :  { %1466 = vperm.xlu2 %2433, %v3461_v47   ;;  %v2286_v47 = vld [vmem:[%s4250_s0 + $0x3d8] sm:$0xff] }
 0x1e7   :  { %2432 = vset.pattern.permute.xlu1 %v4354_v44  ;;  %v2309_v44 = vld [vmem:[%s4250_s0 + $0x490] sm:$0xff]  ;;  %v1190_v43 = vmul.f32 %v2286_v47, %v3770_v31  ;;  %v2279_v31 = vld [vmem:[%s4250_s0 + $0x3a0] sm:$0xff] }
 0x1e8   :  { %1144 = vperm.xlu1 %2432, %v3506_v19   ;;  %v1270_v34 = vpop.permute.xlu1 %1269 }
 0x1e9   :  { %v3808_v41 = vpop.permute.xlu2 %1164  ;;  %v1326_v42 = vmul.f32 %v2293_v4, %v1270_v34  ;;  %v1222_v55 = vmul.f32 %v1190_v43, %v1190_v43  ;;  %v1206_v33 = vadd.f32 %v1190_v43, %v3606_v61 }
 0x1eb   :  { %v1358_v8 = vmul.f32 %v1326_v42, %v1326_v42  ;;  %v1342_v30 = vadd.f32 %v1326_v42, %v1197_v14  ;;  %v1238_v45 = vadd.f32 %v1222_v55, %v3621_v18  ;;  %v1351_v38 = vadd.f32 %v1335_v49, %v1206_v33 }
 0x1ec   :  { %v1182_v42 = vmul.f32 %v2278_v28, %v3785_v50 }
 0x1ed   :  { %v1374_v35 = vadd.f32 %v1358_v8, %v1229_v57  ;;  %v1278_v60 = vpop.permute.xlu0 %1277  ;;  %v1383_v61 = vadd.f32 %v1367_v21, %v1238_v45  ;;  %v1472_v57 = vmul.f32 %v2310_v58, %v3797_v27 }
 0x1ee   :  { %v1328_v47 = vmul.f32 %v2295_v62, %v1278_v60  ;;  %v1214_v50 = vmul.f32 %v1182_v42, %v1182_v42 }
 0x1ef   :  { %v1504_v27 = vmul.f32 %v1472_v57, %v1472_v57 }
 0x1f0   :  { %2435 = vset.pattern.permute.xlu1 %v2524_v17  ;;  %v1360_v49 = vmul.f32 %v1328_v47, %v1328_v47 }
 0x1f1   :  { %v1133_v5 = vpop.permute.xlu2 %1132  ;;  %1434 = vperm.xlu1 %2435, %v3506_v19   ;;  %v1415_v37 = vpop.permute.xlu1 %1414  ;;  %v2318_v19 = vld [vmem:[%s4250_s0 + $0x4d8] sm:$0xff] }
 0x1f2   :  { %v1471_v15 = vmul.f32 %v2309_v44, %v1415_v37  ;;  %v1183_v11 = vmul.f32 %v2279_v31, %v1133_v5  ;;  %v2294_v37 = vld [vmem:[%s4250_s0 + $0x418] sm:$0xff] }
 0x1f4   :  { %v1487_v6 = vadd.f32 %v1471_v15, %v1342_v30  ;;  %v1503_v53 = vmul.f32 %v1471_v15, %v1471_v15  ;;  %v1215_v44 = vmul.f32 %v1183_v11, %v1183_v11  ;;  %v1199_v63 = vadd.f32 %v1183_v11, %v3653_v39  ;;  %v2311_v30 = vld [vmem:[%s4250_s0 + $0x4a0] sm:$0xff] }
 0x1f5   :  { %v1198_v39 = vadd.f32 %v1182_v42, %v3551_v2  ;;  %v2271_v2 = vld [vmem:[%s4250_s0 + $0x360] sm:$0xff] }
 0x1f6   :  { %v1519_v17 = vadd.f32 %v1503_v53, %v1374_v35  ;;  %v1535_v25 = vmul.f32 %v1487_v6, %v1487_v6  ;;  %v1231_v15 = vadd.f32 %v1215_v44, %v3656_v20 }
 0x1f8   :  { %v1551_v13 = vsub.f32 %v1535_v25, %v1519_v17  ;;  %v1344_v17 = vadd.f32 %v1328_v47, %v1199_v63 }
 0x1f9   :  { %v1451_v46 = vpop.permute.xlu1 %1450 }
 0x1fa   :  { %v1567_v12 = vmul.f32 0.5, %v1551_v13  ;;  %v1480_v54 = vmul.f32 %v2318_v19, %v1451_v46  ;;  %v3840_v34 = vpop.permute.xlu2 %1023  ;;  %v1230_v19 = vadd.f32 %v1214_v50, %v3554_v26  ;;  %v1376_v13 = vadd.f32 %v1360_v49, %v1231_v15  ;;  %v2287_v26 = vld [vmem:[%s4250_s0 + $0x3e0] sm:$0xff] }
 0x1fb   :  { %v1191_v42 = vmul.f32 %v2287_v26, %v3808_v41 }
 0x1fc   :  { %v1496_v4 = vadd.f32 %v1480_v54, %v1351_v38  ;;  %v1512_v9 = vmul.f32 %v1480_v54, %v1480_v54  ;;  %v1587_v18 = vmul.f32 %v3691_v23, %v1567_v12  ;;  %v1046_v54 = vmul.f32 %v2271_v2, %v3789_v22  ;;  %v2272_v2 = vld [vmem:[%s4250_s0 + $0x368] sm:$0xff] }
 0x1fd   :  { %v1223_v63 = vmul.f32 %v1191_v42, %v1191_v42 }
 0x1fe   :  { %v1528_v14 = vadd.f32 %v1512_v9, %v1383_v61  ;;  %v1544_v8 = vmul.f32 %v1496_v4, %v1496_v4  ;;  %v1607_v43 = vadd.f32 %v3699_v24, %v1587_v18  ;;  %v2303_v18 = vld [vmem:[%s4250_s0 + $0x460] sm:$0xff]  ;;  %v1078_v44 = vmul.f32 %v1046_v54, %v1046_v54 }
 0x1ff   :  { %v1062_v22 = vadd.f32 %v1046_v54, %v3568_v56  ;;  %v1760_v56 = vld [vmem:[%s4257_s7 + $0x8] sm:$0xff]  ;;  %v1047_v54 = vmul.f32 %v2272_v2, %v3840_v34  ;;  %v2305_v2 = vld [vmem:[%s4250_s0 + $0x470] sm:$0xff] }
 0x200   :  { %v1560_v5 = vsub.f32 %v1544_v8, %v1528_v14  ;;  %2325 = vmatmul.msk.f32.gmra.mxu0 %vm1629_vm0, %v1607_v43  ;;  %v1762_v8 = vld [vmem:[%s4257_s7 + $0x18] sm:$0xff] }
 0x201   :  { %1827 = vmatpush.msra.mxu1 %v1762_v8  ;;  %2360 = vmatpush.msra.mxu3 %v1762_v8 }
 0x202   :  { %v1576_v35 = vmul.f32 0.5, %v1560_v5  ;;  %v1274_v6 = vpop.permute.xlu1 %1273  ;;  %v1761_v5 = vld [vmem:[%s4257_s7 + $0x10] sm:$0xff] }
 0x203   :  { %v1327_v53 = vmul.f32 %v2294_v37, %v1274_v6  ;;  %v1423_v55 = vpop.permute.xlu2 %1422  ;;  %v2319_v37 = vld [vmem:[%s4250_s0 + $0x4e0] sm:$0xff]  ;;  %1828 = vmatpush.msra.mxu1 %v1761_v5  ;;  %2361 = vmatpush.msra.mxu3 %v1761_v5  ;;  %v1063_v5 = vadd.f32 %v1047_v54, %v3513_v52 }
 0x204   :  { %v1473_v25 = vmul.f32 %v2311_v30, %v1423_v55  ;;  %v1596_v31 = vmul.f32 %v3691_v23, %v1576_v35  ;;  %v1207_v30 = vadd.f32 %v1191_v42, %v1062_v22  ;;  %v1759_v35 = vld [vmem:[%s4257_s7] sm:$0xff]  ;;  %s2525_s7 = smov [#allocation5]  }
 0x205   :  { %v1343_v33 = vadd.f32 %v1327_v53, %v1198_v39  ;;  %v1359_v21 = vmul.f32 %v1327_v53, %v1327_v53  ;;  %1829 = vmatpush.msra.mxu1 %v1760_v56  ;;  %2362 = vmatpush.msra.mxu3 %v1760_v56  ;;  %s2167_s14 = sshll.u32 %s2525_s7, 4  ;;  %s2168_s14 = int_to_ptr.vmem [resolvable:$true] %s2167_s14 }
 0x206   :  { %v1489_v45 = vadd.f32 %v1473_v25, %v1344_v17  ;;  %v1505_v46 = vmul.f32 %v1473_v25, %v1473_v25  ;;  %v1616_v20 = vadd.f32 %v3699_v24, %v1596_v31 }
 0x207   :  { %v1375_v28 = vadd.f32 %v1359_v21, %v1230_v19  ;;  %v1488_v38 = vadd.f32 %v1472_v57, %v1343_v33  ;;  %v1094_v57 = vadd.f32 %v1078_v44, %v3576_v3  ;;  %v2280_v3 = vld [vmem:[%s4250_s0 + $0x3a8] sm:$0xff]  ;;  %1830 = vmatpush.msra.mxu1 %v1759_v35  ;;  %2363 = vmatpush.msra.mxu3 %v1759_v35 }
 0x208   :  { %v1521_v11 = vadd.f32 %v1505_v46, %v1376_v13  ;;  %v1537_v12 = vmul.f32 %v1489_v45, %v1489_v45  ;;  %2334 = vmatmul.msk.f32.gmra.mxu2 %vm1629_vm0, %v1616_v20 }
 0x209   :  { %v1520_v62 = vadd.f32 %v1504_v27, %v1375_v28  ;;  %v1536_v60 = vmul.f32 %v1488_v38, %v1488_v38  ;;  %v1239_v6 = vadd.f32 %v1223_v63, %v1094_v57  ;;  %v2296_v27 = vld [vmem:[%s4250_s0 + $0x428] sm:$0xff] }
 0x20a   :  { %v1553_v61 = vsub.f32 %v1537_v12, %v1521_v11  ;;  %v1310_v4 = vpop.permute.xlu1 %1309  ;;  %v2312_v12 = vld [vmem:[%s4250_s0 + $0x4a8] sm:$0xff] }
 0x20b   :  { %v1552_v9 = vsub.f32 %v1536_v60, %v1520_v62  ;;  %v1336_v14 = vmul.f32 %v2303_v18, %v1310_v4  ;;  %v2288_v60 = vld [vmem:[%s4250_s0 + $0x3e8] sm:$0xff] }
 0x20c   :  { %v1137_v47 = vpop.permute.xlu2 %1136  ;;  %v1569_v41 = vmul.f32 0.5, %v1553_v61 }
 0x20d   :  { %v1568_v58 = vmul.f32 0.5, %v1552_v9  ;;  %v1368_v15 = vmul.f32 %v1336_v14, %v1336_v14  ;;  %v1352_v39 = vadd.f32 %v1336_v14, %v1207_v30  ;;  %v1184_v33 = vmul.f32 %v2280_v3, %v1137_v47 }
 0x20e   :  { %v1589_v17 = vmul.f32 %v3691_v23, %v1569_v41 }
 0x20f   :  { %v1588_v43 = vmul.f32 %v3691_v23, %v1568_v58  ;;  %v1384_v25 = vadd.f32 %v1368_v15, %v1239_v6  ;;  %v1216_v28 = vmul.f32 %v1184_v33, %v1184_v33  ;;  %v1200_v26 = vadd.f32 %v1184_v33, %v3573_v0  ;;  %v2320_v0 = vld [vmem:[%s4250_s0 + $0x4e8] sm:$0xff] }
 0x210   :  { %v1609_v46 = vadd.f32 %v3699_v24, %v1589_v17  ;;  %v1482_v63 = vmul.f32 %v2320_v0, %v3817_v59 }
 0x211   :  { %v1608_v50 = vadd.f32 %v3699_v24, %v1588_v43  ;;  %v1232_v9 = vadd.f32 %v1216_v28, %v3580_v32  ;;  %v1079_v43 = vmul.f32 %v1047_v54, %v1047_v54  ;;  %v2304_v32 = vld [vmem:[%s4250_s0 + $0x468] sm:$0xff]  ;;  %v1318_v28 = vpop.permute.xlu0 %1317 }
 0x213   :  { %v1455_v49 = vpop.permute.xlu1 %1454  ;;  %2326 = vmatmul.msk.f32.gmra.mxu0 %vm1629_vm0, %v1608_v50  ;;  %v1095_v57 = vadd.f32 %v1079_v43, %v3518_v40  ;;  %v3933_v40 = vld [vmem:[%s4256_s6] ss:$0 sm:$0xff] }
 0x214   :  { %v1481_v53 = vmul.f32 %v2319_v37, %v1455_v49  ;;  %v1514_v49 = vmul.f32 %v1482_v63, %v1482_v63 }
 0x215   :  { %v1282_v55 = vpop.permute.xlu2 %1281 }
 0x216   :  { %v1497_v31 = vadd.f32 %v1481_v53, %v1352_v39  ;;  %v1513_v19 = vmul.f32 %v1481_v53, %v1481_v53  ;;  %v1329_v45 = vmul.f32 %v2296_v27, %v1282_v55  ;;  %v2273_v27 = vld [vmem:[%s4250_s0 + $0x370] sm:$0xff] }
 0x218   :  { %v1529_v21 = vadd.f32 %v1513_v19, %v1384_v25  ;;  %v1545_v13 = vmul.f32 %v1497_v31, %v1497_v31  ;;  %v1361_v62 = vmul.f32 %v1329_v45, %v1329_v45  ;;  %v1345_v18 = vadd.f32 %v1329_v45, %v1200_v26  ;;  %v2289_v26 = vld [vmem:[%s4250_s0 + $0x3f0] sm:$0xff] }
 0x21a   :  { %v1561_v20 = vsub.f32 %v1545_v13, %v1529_v21  ;;  %v1377_v44 = vadd.f32 %v1361_v62, %v1232_v9 }
 0x21b   :  { %2327 = vmatmul.msk.f32.gmra.mxu0 %vm1629_vm0, %v1609_v46 }
 0x21c   :  { %v1577_v38 = vmul.f32 0.5, %v1561_v20  ;;  %v1169_v11 = vpop.permute.xlu1 %1168 }
 0x21d   :  { %v1192_v47 = vmul.f32 %v2288_v60, %v1169_v11  ;;  %v1338_v60 = vmul.f32 %v2305_v2, %v1318_v28 }
 0x21e   :  { %v1427_v61 = vpop.permute.xlu2 %1426  ;;  %v1597_v4 = vmul.f32 %v3691_v23, %v1577_v38 }
 0x21f   :  { %v1474_v42 = vmul.f32 %v2312_v12, %v1427_v61  ;;  %v1224_v41 = vmul.f32 %v1192_v47, %v1192_v47  ;;  %v1208_v30 = vadd.f32 %v1192_v47, %v1063_v5  ;;  %v2321_v12 = vld [vmem:[%s4250_s0 + $0x4f0] sm:$0xff] }
 0x220   :  { %v1617_v58 = vadd.f32 %v3699_v24, %v1597_v4 }
 0x221   :  { %v1490_v14 = vadd.f32 %v1474_v42, %v1345_v18  ;;  %v1506_v8 = vmul.f32 %v1474_v42, %v1474_v42  ;;  %v1240_v35 = vadd.f32 %v1224_v41, %v1095_v57 }
 0x222   :  { %2335 = vmatmul.msk.f32.gmra.mxu2 %vm1629_vm0, %v1617_v58  ;;  %v1370_v58 = vmul.f32 %v1338_v60, %v1338_v60 }
 0x223   :  { %v1522_v34 = vadd.f32 %v1506_v8, %v1377_v44  ;;  %v1538_v22 = vmul.f32 %v1490_v14, %v1490_v14 }
 0x225   :  { %v1554_v37 = vsub.f32 %v1538_v22, %v1522_v34  ;;  %v1314_v50 = vpop.permute.xlu1 %1313 }
 0x226   :  { %v1337_v15 = vmul.f32 %v2304_v32, %v1314_v50  ;;  %v1463_v17 = vpop.permute.xlu2 %1462 }
 0x227   :  { %v1570_v56 = vmul.f32 0.5, %v1554_v37  ;;  %v1483_v4 = vmul.f32 %v2321_v12, %v1463_v17  ;;  %v1177_v37 = vpop.permute.xlu0 %1176  ;;  %v2297_v17 = vld [vmem:[%s4250_s0 + $0x430] sm:$0xff] }
 0x228   :  { %v1353_v6 = vadd.f32 %v1337_v15, %v1208_v30  ;;  %v1369_v39 = vmul.f32 %v1337_v15, %v1337_v15  ;;  %v2306_v30 = vld [vmem:[%s4250_s0 + $0x478] sm:$0xff]  ;;  %v2313_v12 = vld [vmem:[%s4250_s0 + $0x4b0] sm:$0xff] }
 0x229   :  { %v1590_v3 = vmul.f32 %v3691_v23, %v1570_v56  ;;  %v1515_v0 = vmul.f32 %v1483_v4, %v1483_v4  ;;  %v2274_v15 = vld [vmem:[%s4250_s0 + $0x378] sm:$0xff] }
 0x22a   :  { %v1385_v53 = vadd.f32 %v1369_v39, %v1240_v35  ;;  %v1498_v55 = vadd.f32 %v1482_v63, %v1353_v6 }
 0x22b   :  { %v1610_v59 = vadd.f32 %v3699_v24, %v1590_v3 }
 0x22c   :  { %v1530_v52 = vadd.f32 %v1514_v49, %v1385_v53  ;;  %v1546_v25 = vmul.f32 %v1498_v55, %v1498_v55  ;;  %v2322_v53 = vld [vmem:[%s4250_s0 + $0x4f8] sm:$0xff] }
 0x22d   :  { %2328 = vmatmul.msk.f32.gmra.mxu0 %vm1629_vm0, %v1610_v59 }
 0x22e   :  { %v1562_v31 = vsub.f32 %v1546_v25, %v1530_v52  ;;  %v1028_v19 = vpop.permute.xlu1 %1027 }
 0x22f   :  { %v1048_v45 = vmul.f32 %v2273_v27, %v1028_v19  ;;  %v1286_v11 = vpop.permute.xlu2 %1285 }
 0x230   :  { %v1578_v33 = vmul.f32 0.5, %v1562_v31  ;;  %v1695_v21 = vpop.f32.mrf.mxu0 }
 0x231   :  { %v1696_v13 = vadd.f32 %v3933_v40, %v1695_v21  ;;  %v1080_v62 = vmul.f32 %v1048_v45, %v1048_v45  ;;  %v1064_v61 = vadd.f32 %v1048_v45, %v3487_v10  ;;  %v2290_v10 = vld [vmem:[%s4250_s0 + $0x3f8] sm:$0xff] }
 0x232   :  { %v1598_v46 = vmul.f32 %v3691_v23, %v1578_v33  ;;  %v1194_v49 = vmul.f32 %v2290_v10, %v1177_v37  ;;  %v1330_v33 = vmul.f32 %v2297_v17, %v1286_v11 }
 0x233   :  { %v1743_v20 = vmax.f32 %v1696_v13, 0.0  ;;  %v1096_v18 = vadd.f32 %v1080_v62, %v3495_v1  ;;  %v2281_v1 = vld [vmem:[%s4250_s0 + $0x3b0] sm:$0xff] }
 0x234   :  { %v1618_v38 = vadd.f32 %v3699_v24, %v1598_v46  ;;  %v1226_v19 = vmul.f32 %v1194_v49, %v1194_v49 }
 0x235   :  { %2339 = vmatmul.msk.f32.vlgmr.msra.gmra.mxu1 %vm1629_vm0, %v1743_v20 }
 0x236   :  { %2336 = vmatmul.msk.f32.gmra.mxu2 %vm1629_vm0, %v1618_v38 }
 0x237   :  { %v1173_v54 = vpop.permute.xlu1 %1172  ;;  %v1322_v34 = vpop.permute.xlu2 %1321 }
 0x238   :  { %v1193_v9 = vmul.f32 %v2289_v26, %v1173_v54  ;;  %v1339_v59 = vmul.f32 %v2306_v30, %v1322_v34  ;;  %v1362_v26 = vmul.f32 %v1330_v33, %v1330_v33 }
 0x23a   :  { %v1209_v42 = vadd.f32 %v1193_v9, %v1064_v61  ;;  %v1225_v47 = vmul.f32 %v1193_v9, %v1193_v9  ;;  %v1371_v13 = vmul.f32 %v1339_v59, %v1339_v59 }
 0x23c   :  { %v1241_v44 = vadd.f32 %v1225_v47, %v1096_v18  ;;  %v1354_v14 = vadd.f32 %v1338_v60, %v1209_v42 }
 0x23e   :  { %v1386_v8 = vadd.f32 %v1370_v58, %v1241_v44  ;;  %v1499_v43 = vadd.f32 %v1483_v4, %v1354_v14 }
 0x23f   :  { %v1141_v22 = vpop.permute.xlu1 %1140 }
 0x240   :  { %v1531_v32 = vadd.f32 %v1515_v0, %v1386_v8  ;;  %v1547_v63 = vmul.f32 %v1499_v43, %v1499_v43  ;;  %v1185_v35 = vmul.f32 %v2281_v1, %v1141_v22  ;;  %v1467_v55 = vpop.permute.xlu2 %1466  ;;  %v2282_v43 = vld [vmem:[%s4250_s0 + $0x3b8] sm:$0xff] }
 0x241   :  { %v1484_v27 = vmul.f32 %v2322_v53, %v1467_v55 }
 0x242   :  { %v1563_v5 = vsub.f32 %v1547_v63, %v1531_v32  ;;  %v1217_v21 = vmul.f32 %v1185_v35, %v1185_v35  ;;  %v1201_v20 = vadd.f32 %v1185_v35, %v3556_v48 }
 0x243   :  { %v1516_v38 = vmul.f32 %v1484_v27, %v1484_v27 }
 0x244   :  { %v1579_v41 = vmul.f32 0.5, %v1563_v5  ;;  %v1346_v54 = vadd.f32 %v1330_v33, %v1201_v20  ;;  %v2298_v5 = vld [vmem:[%s4250_s0 + $0x438] sm:$0xff] }
 0x245   :  { %v1719_v50 = vpop.f32.mrf.mxu2 }
 0x246   :  { %v1720_v57 = vadd.f32 %v3933_v40, %v1719_v50  ;;  %v1599_v56 = vmul.f32 %v3691_v23, %v1579_v41  ;;  %v1290_v41 = vpop.permute.xlu0 %1289 }
 0x247   :  { %v1331_v50 = vmul.f32 %v2298_v5, %v1290_v41 }
 0x248   :  { %v1751_v6 = vmax.f32 %v1720_v57, 0.0  ;;  %v1032_v39 = vpop.permute.xlu1 %1031  ;;  %v1619_v3 = vadd.f32 %v3699_v24, %v1599_v56 }
 0x249   :  { %v1049_v52 = vmul.f32 %v2274_v15, %v1032_v39  ;;  %v2314_v15 = vld [vmem:[%s4250_s0 + $0x4b8] sm:$0xff] }
 0x24a   :  { %2337 = vmatmul.msk.f32.gmra.mxu2 %vm1629_vm0, %v1619_v3  ;;  %2347 = vmatmul.msk.f32.vlgmr.msra.gmra.mxu3 %vm1629_vm0, %v1751_v6 }
 0x24b   :  { %v1065_v25 = vadd.f32 %v1049_v52, %v3597_v7  ;;  %v1081_v31 = vmul.f32 %v1049_v52, %v1049_v52  ;;  %v1233_v7 = vadd.f32 %v1217_v21, %v3565_v36 }
 0x24d   :  { %v1097_v45 = vadd.f32 %v1081_v31, %v3603_v29  ;;  %v1210_v46 = vadd.f32 %v1194_v49, %v1065_v25  ;;  %v1378_v18 = vadd.f32 %v1362_v26, %v1233_v7  ;;  %v1363_v49 = vmul.f32 %v1331_v50, %v1331_v50 }
 0x24f   :  { %v1242_v2 = vadd.f32 %v1226_v19, %v1097_v45  ;;  %v1355_v28 = vadd.f32 %v1339_v59, %v1210_v46 }
 0x251   :  { %v1387_v62 = vadd.f32 %v1371_v13, %v1242_v2  ;;  %v1500_v60 = vadd.f32 %v1484_v27, %v1355_v28  ;;  %v1431_v11 = vpop.permute.xlu1 %1430 }
 0x252   :  { %v1475_v61 = vmul.f32 %v2313_v12, %v1431_v11  ;;  %v1722_v4 = vpop.f32.mrf.mxu2 }
 0x253   :  { %v1532_v29 = vadd.f32 %v1516_v38, %v1387_v62  ;;  %v1548_v9 = vmul.f32 %v1500_v60, %v1500_v60  ;;  %v1723_v48 = vadd.f32 %v3933_v40, %v1722_v4 }
 0x254   :  { %v1491_v42 = vadd.f32 %v1475_v61, %v1346_v54  ;;  %v1507_v47 = vmul.f32 %v1475_v61, %v1475_v61 }
 0x255   :  { %v1564_v58 = vsub.f32 %v1548_v9, %v1532_v29  ;;  %v1752_v0 = vmax.f32 %v1723_v48, 0.0  ;;  %v4025_v9 = vld [vmem:[%s4258_s8] ss:$0 sm:$0xff] }
 0x256   :  { %v1523_v44 = vadd.f32 %v1507_v47, %v1378_v18  ;;  %v1539_v14 = vmul.f32 %v1491_v42, %v1491_v42  ;;  %v4031_v42 = vld [vmem:[%s4259_s9] ss:$0 sm:$0xff] }
 0x257   :  { %v1580_v8 = vmul.f32 0.5, %v1564_v58  ;;  %2348 = vmatmul.msk.f32.gmra.mxu3 %vm1629_vm0, %v1752_v0 }
 0x258   :  { %v1555_v36 = vsub.f32 %v1539_v14, %v1523_v44 }
 0x259   :  { %v1600_v34 = vmul.f32 %v3691_v23, %v1580_v8 }
 0x25a   :  { %v1571_v22 = vmul.f32 0.5, %v1555_v36  ;;  %v1145_v32 = vpop.permute.xlu1 %1144 }
 0x25b   :  { %v1186_v63 = vmul.f32 %v2282_v43, %v1145_v32  ;;  %v1620_v10 = vadd.f32 %v3699_v24, %v1600_v34 }
 0x25c   :  { %v1591_v37 = vmul.f32 %v3691_v23, %v1571_v22 }
 0x25d   :  { %2338 = vmatmul.msk.f32.gmra.mxu2 %vm1629_vm0, %v1620_v10  ;;  %v1218_v1 = vmul.f32 %v1186_v63, %v1186_v63  ;;  %v1202_v30 = vadd.f32 %v1186_v63, %v3673_v16 }
 0x25e   :  { %v1611_v57 = vadd.f32 %v3699_v24, %v1591_v37 }
 0x25f   :  { %v1234_v56 = vadd.f32 %v1218_v1, %v3679_v51  ;;  %v1347_v3 = vadd.f32 %v1331_v50, %v1202_v30 }
 0x260   :  { %2329 = vmatmul.msk.f32.gmra.mxu0 %vm1629_vm0, %v1611_v57 }
 0x261   :  { %v1379_v59 = vadd.f32 %v1363_v49, %v1234_v56 }
 0x262   :  { %v1698_v35 = vpop.f32.mrf.mxu0 }
 0x263   :  { %v1699_v6 = vadd.f32 %v3933_v40, %v1698_v35  ;;  %v1435_v39 = vpop.permute.xlu1 %1434 }
 0x264   :  { %v1476_v53 = vmul.f32 %v2314_v15, %v1435_v39 }
 0x265   :  { %v1744_v55 = vmax.f32 %v1699_v6, 0.0  ;;  %v1725_v17 = vpop.f32.mrf.mxu2 }
 0x266   :  { %v1492_v52 = vadd.f32 %v1476_v53, %v1347_v3  ;;  %v1508_v16 = vmul.f32 %v1476_v53, %v1476_v53  ;;  %v1726_v25 = vadd.f32 %v3933_v40, %v1725_v17 }
 0x267   :  { %2340 = vmatmul.msk.f32.gmra.mxu1 %vm1629_vm0, %v1744_v55 }
 0x268   :  { %v1524_v31 = vadd.f32 %v1508_v16, %v1379_v59  ;;  %v1540_v19 = vmul.f32 %v1492_v52, %v1492_v52  ;;  %v1753_v27 = vmax.f32 %v1726_v25, 0.0 }
 0x26a   :  { %v1556_v51 = vsub.f32 %v1540_v19, %v1524_v31  ;;  %2349 = vmatmul.msk.f32.gmra.mxu3 %vm1629_vm0, %v1753_v27 }
 0x26c   :  { %v1572_v33 = vmul.f32 0.5, %v1556_v51 }
 0x26e   :  { %v1592_v21 = vmul.f32 %v3691_v23, %v1572_v33 }
 0x270   :  { %v1612_v13 = vadd.f32 %v3699_v24, %v1592_v21 }
 0x272   :  { %2330 = vmatmul.msk.f32.gmra.mxu0 %vm1629_vm0, %v1612_v13 }
 0x27d   :  { %v1701_v45 = vpop.f32.mrf.mxu0 }
 0x27e   :  { %v1702_v46 = vadd.f32 %v3933_v40, %v1701_v45 }
 0x280   :  { %v1745_v20 = vmax.f32 %v1702_v46, 0.0 }
 0x282   :  { %2341 = vmatmul.msk.f32.gmra.mxu1 %vm1629_vm0, %v1745_v20 }
 0x28b   :  { %v1728_v2 = vpop.f32.mrf.mxu2 }
 0x28c   :  { %v1729_v28 = vadd.f32 %v3933_v40, %v1728_v2 }
 0x28e   :  { %v1754_v38 = vmax.f32 %v1729_v28, 0.0 }
 0x290   :  { %v1704_v12 = vpop.f32.mrf.mxu0  ;;  %2350 = vmatmul.msk.f32.gmra.mxu3 %vm1629_vm0, %v1754_v38 }
 0x291   :  { %v1705_v26 = vadd.f32 %v3933_v40, %v1704_v12 }
 0x293   :  { %v1746_v23 = vmax.f32 %v1705_v26, 0.0 }
 0x295   :  { %2342 = vmatmul.msk.f32.gmra.mxu1 %vm1629_vm0, %v1746_v23 }
 0x298   :  { %v1707_v24 = vpop.f32.mrf.mxu0 }
 0x299   :  { %v1708_v7 = vadd.f32 %v3933_v40, %v1707_v24 }
 0x29b   :  { %v1747_v62 = vmax.f32 %v1708_v7, 0.0 }
 0x29d   :  { %2343 = vmatmul.msk.f32.gmra.mxu1 %vm1629_vm0, %v1747_v62 }
 0x2a5   :  { %v1731_v60 = vpop.f32.mrf.mxu2 }
 0x2a6   :  { %v1732_v11 = vadd.f32 %v3933_v40, %v1731_v60  ;;  %v1966_v60 = vld [vmem:[%s4251_s1 + $0x10] sm:$0xff] }
 0x2a8   :  { %v1755_v54 = vmax.f32 %v1732_v11, 0.0 }
 0x2aa   :  { %v1710_v61 = vpop.f32.mrf.mxu0  ;;  %2351 = vmatmul.msk.f32.gmra.mxu3 %vm1629_vm0, %v1755_v54  ;;  %v2458_v54 = vld [vmem:[%s4252_s2 + $0x10] sm:$0xff] }
 0x2ab   :  { %v1711_v4 = vadd.f32 %v3933_v40, %v1710_v61  ;;  %v1982_v61 = vmul.f32 %v2458_v54, %v1966_v60  ;;  %v2467_v60 = vld [vmem:[%s4252_s2 + $0x20] sm:$0xff] }
 0x2ad   :  { %v1748_v29 = vmax.f32 %v1711_v4, 0.0  ;;  %v2003_v4 = vsel %vm1996_vm1, %v1982_v61, 0.0 }
 0x2af   :  { %2344 = vmatmul.msk.f32.gmra.mxu1 %vm1629_vm0, %v1748_v29  ;;  %v1969_v29 = vld [vmem:[%s4251_s1 + $0x28] sm:$0xff] }
 0x2b2   :  { %v1832_v48 = vpop.f32.mrf.mxu1 }
 0x2b3   :  { %v1833_v18 = vadd.f32 %v4025_v9, %v1832_v48  ;;  %v2459_v48 = vld [vmem:[%s4252_s2 + $0x28] sm:$0xff] }
 0x2b5   :  { %v1880_v47 = vmax.f32 %v1833_v18, 0.0  ;;  %v1985_v18 = vmul.f32 %v2459_v48, %v1969_v29  ;;  %v1971_v48 = vld [vmem:[%s4251_s1 + $0x38] sm:$0xff] }
 0x2b7   :  { %v1900_v58 = vmul.f32 %v4031_v42, %v1880_v47  ;;  %v2012_v47 = vsel %vm1996_vm1, %v1985_v18, 0.0  ;;  %v1978_v18 = vld [vmem:[%s4251_s1 + $0x70] sm:$0xff] }
 0x2b9   :  { %v1916_v0 = vsel %vm1629_vm0, %v1900_v58, 0.0  ;;  %v1734_v44 = vpop.f32.mrf.mxu2  ;;  %v1972_v58 = vld [vmem:[%s4251_s1 + $0x40] sm:$0xff] }
 0x2ba   :  { %1917 = vadd.xlane.f32.xlu2 %v1916_v0  ;;  %v1735_v14 = vadd.f32 %v3933_v40, %v1734_v44  ;;  %v2460_v44 = vld [vmem:[%s4252_s2 + $0x40] sm:$0xff] }
 0x2bc   :  { %v1756_v8 = vmax.f32 %v1735_v14, 0.0  ;;  %v1988_v14 = vmul.f32 %v2460_v44, %v1972_v58  ;;  %v2469_v44 = vld [vmem:[%s4252_s2 + $0x38] sm:$0xff] }
 0x2be   :  { %2352 = vmatmul.msk.f32.gmra.mxu3 %vm1629_vm0, %v1756_v8  ;;  %v2021_v8 = vsel %vm1996_vm1, %v1988_v14, 0.0  ;;  %v1987_v14 = vmul.f32 %v2469_v44, %v1971_v48 }
 0x2cd   :  { %v1737_v36 = vpop.f32.mrf.mxu2  ;;  %v1856_v31 = vpop.f32.mrf.mxu3 }
 0x2ce   :  { %v1738_v43 = vadd.f32 %v3933_v40, %v1737_v36  ;;  %v1857_v46 = vadd.f32 %v4025_v9, %v1856_v31  ;;  %v1975_v36 = vld [vmem:[%s4251_s1 + $0x58] sm:$0xff] }
 0x2d0   :  { %v1757_v34 = vmax.f32 %v1738_v43, 0.0  ;;  %v1888_v28 = vmax.f32 %v1857_v46, 0.0  ;;  %v2464_v46 = vld [vmem:[%s4252_s2 + $0x30] sm:$0xff] }
 0x2d2   :  { %2353 = vmatmul.msk.f32.gmra.mxu3 %vm1629_vm0, %v1757_v34  ;;  %v1908_v26 = vmul.f32 %v4031_v42, %v1888_v28  ;;  %v2461_v34 = vld [vmem:[%s4252_s2 + $0x58] sm:$0xff] }
 0x2d4   :  { %v1940_v7 = vsel %vm1629_vm0, %v1908_v26, 0.0 }
 0x2da   :  { %v1859_v33 = vpop.f32.mrf.mxu3 }
 0x2dd   :  { %v1713_v22 = vpop.f32.mrf.mxu0 }
 0x2de   :  { %v1714_v32 = vadd.f32 %v3933_v40, %v1713_v22  ;;  %v1991_v22 = vmul.f32 %v2461_v34, %v1975_v36  ;;  %v1977_v36 = vld [vmem:[%s4251_s1 + $0x68] sm:$0xff]  ;;  %v2018_v34 = vsel %vm1996_vm1, %v1987_v14, 0.0 }
 0x2e0   :  { %v1749_v63 = vmax.f32 %v1714_v32, 0.0  ;;  %v1740_v5 = vpop.f32.mrf.mxu2 }
 0x2e1   :  { %v1741_v41 = vadd.f32 %v3933_v40, %v1740_v5 }
 0x2e2   :  { %2345 = vmatmul.msk.f32.gmra.mxu1 %vm1629_vm0, %v1749_v63 }
 0x2e3   :  { %v1758_v10 = vmax.f32 %v1741_v41, 0.0  ;;  %v2030_v41 = vsel %vm1996_vm1, %v1991_v22, 0.0 }
 0x2e4   :  { %v1835_v37 = vpop.f32.mrf.mxu1 }
 0x2e5   :  { %v1836_v1 = vadd.f32 %v4025_v9, %v1835_v37  ;;  %2354 = vmatmul.msk.f32.gmra.mxu3 %vm1629_vm0, %v1758_v10  ;;  %v1860_v10 = vadd.f32 %v4025_v9, %v1859_v33 }
 0x2e7   :  { %v1881_v50 = vmax.f32 %v1836_v1, 0.0 }
 0x2e9   :  { %v1901_v57 = vmul.f32 %v4031_v42, %v1881_v50 }
 0x2eb   :  { %v1919_v30 = vsel %vm1629_vm0, %v1901_v57, 0.0  ;;  %v1889_v57 = vmax.f32 %v1860_v10, 0.0  ;;  %v2471_v10 = vld [vmem:[%s4252_s2 + $0x50] sm:$0xff] }
 0x2ec   :  { %1920 = vadd.xlane.f32.xlu1 %v1919_v30 }
 0x2ed   :  { %v1862_v21 = vpop.f32.mrf.mxu3 }
 0x2ef   :  { %v1716_v15 = vpop.f32.mrf.mxu0 }
 0x2f0   :  { %v1717_v56 = vadd.f32 %v3933_v40, %v1716_v15 }
 0x2f2   :  { %v1750_v49 = vmax.f32 %v1717_v56, 0.0  ;;  %v1909_v56 = vmul.f32 %v4031_v42, %v1889_v57 }
 0x2f4   :  { %2346 = vmatmul.msk.f32.gmra.mxu1 %vm1629_vm0, %v1750_v49 }
 0x2ff   :  { %v1838_v35 = vpop.f32.mrf.mxu1 }
 0x300   :  { %v1839_v6 = vadd.f32 %v4025_v9, %v1838_v35  ;;  %v1964_v35 = vld [vmem:[%s4251_s1] sm:$0xff] }
 0x302   :  { %v1882_v39 = vmax.f32 %v1839_v6, 0.0  ;;  %v1943_v6 = vsel %vm1629_vm0, %v1909_v56, 0.0  ;;  %v2472_v56 = vld [vmem:[%s4252_s2 + $0x60] sm:$0xff] }
 0x304   :  { %v1902_v3 = vmul.f32 %v4031_v42, %v1882_v39  ;;  %v2462_v39 = vld [vmem:[%s4252_s2] sm:$0xff] }
 0x306   :  { %v1922_v53 = vsel %vm1629_vm0, %v1902_v3, 0.0  ;;  %v1980_v3 = vmul.f32 %v2462_v39, %v1964_v35 }
 0x307   :  { %1923 = vadd.xlane.f32.xlu0 %v1922_v53 }
 0x312   :  { %v1841_v55 = vpop.f32.mrf.mxu1 }
 0x313   :  { %v1842_v17 = vadd.f32 %v4025_v9, %v1841_v55  ;;  %v1865_v12 = vpop.f32.mrf.mxu3 }
 0x314   :  { %v1866_v23 = vadd.f32 %v4025_v9, %v1865_v12  ;;  %v1973_v12 = vld [vmem:[%s4251_s1 + $0x48] sm:$0xff] }
 0x315   :  { %v1883_v59 = vmax.f32 %v1842_v17, 0.0  ;;  %v1863_v17 = vadd.f32 %v4025_v9, %v1862_v21  ;;  %v1970_v21 = vld [vmem:[%s4251_s1 + $0x30] sm:$0xff] }
 0x316   :  { %v1891_v24 = vmax.f32 %v1866_v23, 0.0  ;;  %v1968_v23 = vld [vmem:[%s4251_s1 + $0x20] sm:$0xff] }
 0x317   :  { %v1903_v52 = vmul.f32 %v4031_v42, %v1883_v59 }
 0x318   :  { %v1911_v62 = vmul.f32 %v4031_v42, %v1891_v24  ;;  %v2466_v24 = vld [vmem:[%s4252_s2 + $0x48] sm:$0xff] }
 0x319   :  { %v1925_v40 = vsel %vm1629_vm0, %v1903_v52, 0.0  ;;  %v1997_v52 = vsel %vm1996_vm1, %v1980_v3, 0.0 }
 0x31a   :  { %1926 = vadd.xlane.f32.xlu2 %v1925_v40  ;;  %v1844_v16 = vpop.f32.mrf.mxu1  ;;  %v1949_v11 = vsel %vm1629_vm0, %v1911_v62, 0.0  ;;  %v1967_v40 = vld [vmem:[%s4251_s1 + $0x18] sm:$0xff] }
 0x31b   :  { %v1845_v25 = vadd.f32 %v4025_v9, %v1844_v16 }
 0x31d   :  { %v1884_v19 = vmax.f32 %v1845_v25, 0.0  ;;  %v1890_v25 = vmax.f32 %v1863_v17, 0.0 }
 0x31f   :  { %v1904_v27 = vmul.f32 %v4031_v42, %v1884_v19  ;;  %v2463_v19 = vld [vmem:[%s4252_s2 + $0x18] sm:$0xff]  ;;  %v1910_v33 = vmul.f32 %v4031_v42, %v1890_v25 }
 0x321   :  { %v1928_v51 = vsel %vm1629_vm0, %v1904_v27, 0.0  ;;  %v1983_v27 = vmul.f32 %v2463_v19, %v1967_v40 }
 0x322   :  { %1929 = vadd.xlane.f32.xlu2 %v1928_v51 }
 0x323   :  { %v2006_v51 = vsel %vm1996_vm1, %v1983_v27, 0.0 }
 0x32c   :  { %v1847_v13 = vpop.f32.mrf.mxu1 }
 0x32d   :  { %v1848_v45 = vadd.f32 %v4025_v9, %v1847_v13  ;;  %v4083_v0 = vpop.f32.mrf.mxu3  ;;  %v1965_v13 = vld [vmem:[%s4251_s1 + $0x8] sm:$0xff]  ;;  %v1918_v40 = vpop.xlane.xlu2 %1917 }
 0x32e   :  { %v1869_v62 = vadd.f32 %v4025_v9, %v4083_v0 }
 0x32f   :  { %v1885_v20 = vmax.f32 %v1848_v45, 0.0  ;;  %v1946_v45 = vsel %vm1629_vm0, %v1910_v33, 0.0 }
 0x330   :  { %v1892_v61 = vmax.f32 %v1869_v62, 0.0 }
 0x331   :  { %v1905_v2 = vmul.f32 %v4031_v42, %v1885_v20  ;;  %v1986_v20 = vmul.f32 %v2464_v46, %v1970_v21 }
 0x332   :  { %v1912_v0 = vmul.f32 %v4031_v42, %v1892_v61 }
 0x333   :  { %v1931_v38 = vsel %vm1629_vm0, %v1905_v2, 0.0  ;;  %v2465_v2 = vld [vmem:[%s4252_s2 + $0x8] sm:$0xff] }
 0x334   :  { %1932 = vadd.xlane.f32.xlu1 %v1931_v38  ;;  %v1981_v28 = vmul.f32 %v2465_v2, %v1965_v13  ;;  %v2015_v38 = vsel %vm1996_vm1, %v1986_v20, 0.0 }
 0x336   :  { %v2000_v26 = vsel %vm1996_vm1, %v1981_v28, 0.0 }
 0x33c   :  { %1941 = vadd.xlane.f32.xlu1 %v1940_v7  ;;  %v1989_v7 = vmul.f32 %v2466_v24, %v1973_v12 }
 0x33e   :  { %v2024_v54 = vsel %vm1996_vm1, %v1989_v7, 0.0 }
 0x341   :  { %v1871_v43 = vpop.f32.mrf.mxu3 }
 0x342   :  { %v1872_v32 = vadd.f32 %v4025_v9, %v1871_v43  ;;  %v1952_v43 = vsel %vm1629_vm0, %v1912_v0, 0.0 }
 0x344   :  { %1950 = vadd.xlane.f32.xlu1 %v1949_v11  ;;  %v1893_v1 = vmax.f32 %v1872_v32, 0.0  ;;  %v1984_v11 = vmul.f32 %v2467_v60, %v1968_v23  ;;  %v1974_v32 = vld [vmem:[%s4251_s1 + $0x50] sm:$0xff]  ;;  %v2097_v23 = vlaneseq }
 0x346   :  { %v1913_v15 = vmul.f32 %v4031_v42, %v1893_v1  ;;  %v4209_v62 = vand.u32 127, %v2097_v23 }
 0x348   :  { %v1955_v49 = vsel %vm1629_vm0, %v1913_v15, 0.0  ;;  %v2100_v61 = vadd.s32 4294967288, %v4209_v62  ;;  %v2104_v14 = vadd.s32 4294967280, %v4209_v62 }
 0x34c   :  { %2004 = vadd.xlane.f32.xlu1 %v2003_v4  ;;  %v2009_v4 = vsel %vm1996_vm1, %v1984_v11, 0.0 }
 0x354   :  { %2013 = vadd.xlane.f32.xlu1 %v2012_v47  ;;  %v2468_v47 = vld [vmem:[%s4252_s2 + $0x70] sm:$0xff] }
 0x355   :  { %v1874_v29 = vpop.f32.mrf.mxu3  ;;  %v1994_v58 = vmul.f32 %v2468_v47, %v1978_v18 }
 0x356   :  { %v1875_v35 = vadd.f32 %v4025_v9, %v1874_v29 }
 0x358   :  { %v1894_v3 = vmax.f32 %v1875_v35, 0.0 }
 0x35c   :  { %2022 = vadd.xlane.f32.xlu1 %v2021_v8  ;;  %v2039_v8 = vsel %vm1996_vm1, %v1994_v58, 0.0 }
 0x35f   :  { %v1850_v63 = vpop.f32.mrf.mxu1  ;;  %v1921_v25 = vpop.xlane.xlu1 %1920 }
 0x360   :  { %v1851_v5 = vadd.f32 %v4025_v9, %v1850_v63  ;;  %v2470_v63 = vld [vmem:[%s4252_s2 + $0x68] sm:$0xff] }
 0x362   :  { %v1886_v37 = vmax.f32 %v1851_v5, 0.0  ;;  %v1993_v5 = vmul.f32 %v2470_v63, %v1977_v36  ;;  %v2108_v63 = vadd.s32 4294967272, %v4209_v62 }
 0x364   :  { %v1906_v50 = vmul.f32 %v4031_v42, %v1886_v37  ;;  %2031 = vadd.xlane.f32.xlu1 %v2030_v41  ;;  %v1990_v37 = vmul.f32 %v2471_v10, %v1974_v32  ;;  %v2036_v1 = vsel %vm1996_vm1, %v1993_v5, 0.0 }
 0x366   :  { %v1934_v30 = vsel %vm1629_vm0, %v1906_v50, 0.0  ;;  %v2027_v57 = vsel %vm1996_vm1, %v1990_v37, 0.0 }
 0x367   :  { %1935 = vadd.xlane.f32.xlu2 %v1934_v30  ;;  %v1976_v30 = vld [vmem:[%s4251_s1 + $0x60] sm:$0xff] }
 0x368   :  { %v1877_v22 = vpop.f32.mrf.mxu3 }
 0x369   :  { %v1878_v41 = vadd.f32 %v4025_v9, %v1877_v22 }
 0x36b   :  { %v1895_v50 = vmax.f32 %v1878_v41, 0.0 }
 0x36c   :  { %1956 = vadd.xlane.f32.xlu1 %v1955_v49  ;;  %v1992_v49 = vmul.f32 %v2472_v56, %v1976_v30 }
 0x36d   :  { %v1915_v15 = vmul.f32 %v4031_v42, %v1895_v50 }
 0x36e   :  { %v2033_v39 = vsel %vm1996_vm1, %v1992_v49, 0.0 }
 0x36f   :  { %1944 = vadd.xlane.f32.xlu2 %v1943_v6  ;;  %v1961_v6 = vsel %vm1629_vm0, %v1915_v15, 0.0  ;;  %v2116_v15 = vadd.s32 4294967256, %v4209_v62 }
 0x371   :  { %v1853_v53 = vpop.f32.mrf.mxu1 }
 0x372   :  { %v1854_v55 = vadd.f32 %v4025_v9, %v1853_v53  ;;  %v1914_v53 = vmul.f32 %v4031_v42, %v1894_v3  ;;  %v2473_v9 = vld [vmem:[%s4252_s2 + $0x78] sm:$0xff]  ;;  %s2355_s2 = sld [smem:[#allocation2 + $0x1]]  ;;  %v2124_v3 = vadd.s32 4294967240, %v4209_v62 }
 0x374   :  { %v1887_v59 = vmax.f32 %v1854_v55, 0.0  ;;  %2040 = vadd.xlane.f32.xlu1 %v2039_v8  ;;  %v1979_v55 = vld [vmem:[%s4251_s1 + $0x78] sm:$0xff]  ;;  %v1958_v17 = vsel %vm1629_vm0, %v1914_v53, 0.0  ;;  %s2061_s1 = sld [smem:[#allocation2]] }
 0x376   :  { %v1907_v16 = vmul.f32 %v4031_v42, %v1887_v59  ;;  %v1995_v59 = vmul.f32 %v2473_v9, %v1979_v55  ;;  %v2120_v55 = vadd.s32 4294967248, %v4209_v62 }
 0x377   :  { %1998 = vadd.xlane.f32.xlu2 %v1997_v52 }
 0x378   :  { %v1937_v31 = vsel %vm1629_vm0, %v1907_v16, 0.0  ;;  %v2042_v52 = vsel %vm1996_vm1, %v1995_v59, 0.0  ;;  %vm2158_vm0 = vcmask 1048512  }
 0x379   :  { %1938 = vadd.xlane.f32.xlu0 %v1937_v31 }
 0x37a   :  { %s2063_s13 = sadd.f32 %s2355_s2, %s2061_s1 }
 0x37c   :  { %v4211_v11 = vstv %s2063_s13 }
 0x37f   :  { %2007 = vadd.xlane.f32.xlu2 %v2006_v51  ;;  %v1924_v51 = vpop.xlane.xlu0 %1923 }
 0x381   :  { %1947 = vadd.xlane.f32.xlu0 %v1946_v45 }
 0x387   :  { %2016 = vadd.xlane.f32.xlu2 %v2015_v38 }
 0x389   :  { %2001 = vadd.xlane.f32.xlu0 %v2000_v26 }
 0x38d   :  { %v1927_v16 = vpop.xlane.xlu2 %1926 }
 0x38f   :  { %2025 = vadd.xlane.f32.xlu2 %v2024_v54 }
 0x391   :  { %2010 = vadd.xlane.f32.xlu0 %v2009_v4 }
 0x395   :  { %v1930_v31 = vpop.xlane.xlu2 %1929 }
 0x397   :  { %1953 = vadd.xlane.f32.xlu2 %v1952_v43 }
 0x399   :  { %2019 = vadd.xlane.f32.xlu0 %v2018_v34  ;;  %v2112_v34 = vadd.s32 4294967264, %v4209_v62 }
 0x39f   :  { %2037 = vadd.xlane.f32.xlu2 %v2036_v1 }
 0x3a1   :  { %2028 = vadd.xlane.f32.xlu0 %v2027_v57 }
 0x3a7   :  { %1962 = vadd.xlane.f32.xlu2 %v1961_v6  ;;  %v1933_v42 = vpop.xlane.xlu1 %1932 }
 0x3a9   :  { %2034 = vadd.xlane.f32.xlu0 %v2033_v39 }
 0x3af   :  { %v1942_v27 = vpop.xlane.xlu1 %1941 }
 0x3b1   :  { %1959 = vadd.xlane.f32.xlu0 %v1958_v17 }
 0x3b7   :  { %v4207_v21 = vpop.xlane.xlu1 %1950 }
 0x3b9   :  { %2043 = vadd.xlane.f32.xlu0 %v2042_v52 }
 0x3bf   :  { %v2005_v46 = vpop.xlane.xlu1 %2004 }
 0x3c0   :  { %v2047_v29 = vadd.f32 %v2005_v46, %v1924_v51  ;;  %v2136_v46 = vadd.s32 4294967216, %v4209_v62 }
 0x3c2   :  { %v2067_v8 = vadd.f32 %v4211_v11, %v2047_v29 }
 0x3c4   :  { %v2105_v10 = vperm.slane %v2067_v8, %v2104_v14  ;;  %v2148_v8 = vadd.s32 4294967192, %v4209_v62 }
 0x3c7   :  { %v2014_v38 = vpop.xlane.xlu1 %2013 }
 0x3c8   :  { %v2050_v43 = vadd.f32 %v2014_v38, %v1933_v42  ;;  %v2128_v42 = vadd.s32 4294967232, %v4209_v62 }
 0x3ca   :  { %v2070_v56 = vadd.f32 %v4211_v11, %v2050_v43 }
 0x3cc   :  { %v2117_v52 = vperm.slane %v2070_v56, %v2116_v15 }
 0x3cf   :  { %v2023_v24 = vpop.xlane.xlu1 %2022 }
 0x3d0   :  { %v2053_v35 = vadd.f32 %v2023_v24, %v1942_v27  ;;  %v2140_v24 = vadd.s32 4294967208, %v4209_v62 }
 0x3d7   :  { %v2032_v58 = vpop.xlane.xlu1 %2031 }
 0x3d8   :  { %v2056_v51 = vadd.f32 %v2032_v58, %v4207_v21  ;;  %v2144_v21 = vadd.s32 4294967200, %v4209_v62 }
 0x3da   :  { %v1936_v19 = vpop.xlane.xlu2 %1935 }
 0x3df   :  { %v1957_v6 = vpop.xlane.xlu1 %1956 }
 0x3e2   :  { %v4205_v33 = vpop.xlane.xlu2 %1944 }
 0x3ea   :  { %v1999_v45 = vpop.xlane.xlu2 %1998 }
 0x3eb   :  { %v2045_v60 = vadd.f32 %v1999_v45, %v1918_v40 }
 0x3ec   :  { %v1939_v13 = vpop.xlane.xlu0 %1938 }
 0x3ed   :  { %v2065_v18 = vadd.f32 %v4211_v11, %v2045_v60 }
 0x3ef   :  { %v2099_v36 = vperm.slane %v2065_v18, %v4209_v62 }
 0x3f2   :  { %v2008_v2 = vpop.xlane.xlu2 %2007 }
 0x3f3   :  { %v2048_v0 = vadd.f32 %v2008_v2, %v1927_v16 }
 0x3f4   :  { %v1948_v20 = vpop.xlane.xlu0 %1947 }
 0x3f5   :  { %v2068_v5 = vadd.f32 %v4211_v11, %v2048_v0  ;;  %v2152_v0 = vadd.s32 4294967184, %v4209_v62 }
 0x3f7   :  { %v2109_v49 = vperm.slane %v2068_v5, %v2108_v63 }
 0x3fa   :  { %v2017_v12 = vpop.xlane.xlu2 %2016 }
 0x3fb   :  { %v2051_v1 = vadd.f32 %v2017_v12, %v1936_v19  ;;  %v2073_v19 = vadd.f32 %v4211_v11, %v2053_v35  ;;  %v2041_v12 = vpop.xlane.xlu1 %2040 }
 0x3fc   :  { %v2002_v28 = vpop.xlane.xlu0 %2001 }
 0x3fd   :  { %v2046_v7 = vadd.f32 %v2002_v28, %v1921_v25  ;;  %v2071_v17 = vadd.f32 %v4211_v11, %v2051_v1 }
 0x3ff   :  { %v2066_v4 = vadd.f32 %v4211_v11, %v2046_v7  ;;  %v2121_v27 = vperm.slane %v2071_v17, %v2120_v55 }
 0x401   :  { %v2101_v44 = vperm.slane %v2066_v4, %v2100_v61  ;;  %v2076_v4 = vadd.f32 %v4211_v11, %v2056_v51 }
 0x402   :  { %v2026_v48 = vpop.xlane.xlu2 %2025 }
 0x403   :  { %v2103_v41 = vsel %vm2102_vm2, %v2101_v44, %v2099_v36  ;;  %v2054_v16 = vadd.f32 %v2026_v48, %v4205_v33  ;;  %v2132_v33 = vadd.s32 4294967224, %v4209_v62  ;;  %v2141_v14 = vperm.slane %v2076_v4, %v2140_v24 }
 0x404   :  { %v2011_v26 = vpop.xlane.xlu0 %2010  ;;  %v2107_v50 = vsel %vm2106_vm3, %v2105_v10, %v2103_v41 }
 0x405   :  { %v2049_v47 = vadd.f32 %v2011_v26, %v1930_v31  ;;  %v2111_v39 = vsel %vm2110_vm4, %v2109_v49, %v2107_v50  ;;  %v2074_v28 = vadd.f32 %v4211_v11, %v2054_v16  ;;  %v2129_v26 = vperm.slane %v2073_v19, %v2128_v42 }
 0x407   :  { %v2069_v22 = vadd.f32 %v4211_v11, %v2049_v47  ;;  %v2133_v29 = vperm.slane %v2074_v28, %v2132_v33 }
 0x409   :  { %v2113_v57 = vperm.slane %v2069_v22, %v2112_v34  ;;  %v2156_v22 = vadd.s32 4294967176, %v4209_v62 }
 0x40a   :  { %v1954_v30 = vpop.xlane.xlu2 %1953 }
 0x40b   :  { %v2115_v9 = vsel %vm2114_vm5, %v2113_v57, %v2111_v39 }
 0x40c   :  { %v2020_v54 = vpop.xlane.xlu0 %2019  ;;  %v2119_v25 = vsel %vm2118_vm6, %v2117_v52, %v2115_v9 }
 0x40d   :  { %v2052_v37 = vadd.f32 %v2020_v54, %v1939_v13  ;;  %v2123_v13 = vsel %vm2122_vm7, %v2121_v27, %v2119_v25 }
 0x40f   :  { %v2072_v53 = vadd.f32 %v4211_v11, %v2052_v37 }
 0x411   :  { %v2125_v31 = vperm.slane %v2072_v53, %v2124_v3 }
 0x412   :  { %v2038_v45 = vpop.xlane.xlu2 %2037 }
 0x413   :  { %v2127_v38 = vsel %vm2126_vm8, %v2125_v31, %v2123_v13  ;;  %v2058_v48 = vadd.f32 %v2038_v45, %v1957_v6 }
 0x414   :  { %v2029_v32 = vpop.xlane.xlu0 %2028  ;;  %v2131_v7 = vsel %vm2130_vm9, %v2129_v26, %v2127_v38 }
 0x415   :  { %v2055_v40 = vadd.f32 %v2029_v32, %v1948_v20  ;;  %v2135_v18 = vsel %vm2134_vm10, %v2133_v29, %v2131_v7  ;;  %v2078_v36 = vadd.f32 %v4211_v11, %v2058_v48 }
 0x417   :  { %v2075_v2 = vadd.f32 %v4211_v11, %v2055_v40  ;;  %v2149_v10 = vperm.slane %v2078_v36, %v2148_v8 }
 0x419   :  { %v2137_v60 = vperm.slane %v2075_v2, %v2136_v46 }
 0x41a   :  { %v1963_v43 = vpop.xlane.xlu2 %1962 }
 0x41b   :  { %v2139_v47 = vsel %vm2138_vm11, %v2137_v60, %v2135_v18 }
 0x41c   :  { %v2035_v59 = vpop.xlane.xlu0 %2034  ;;  %v2143_v63 = vsel %vm2142_vm12, %v2141_v14, %v2139_v47 }
 0x41d   :  { %v2057_v20 = vadd.f32 %v2035_v59, %v1954_v30 }
 0x41f   :  { %v2077_v54 = vadd.f32 %v4211_v11, %v2057_v20 }
 0x421   :  { %v2145_v58 = vperm.slane %v2077_v54, %v2144_v21 }
 0x423   :  { %v2147_v41 = vsel %vm2146_vm13, %v2145_v58, %v2143_v63 }
 0x424   :  { %v1960_v23 = vpop.xlane.xlu0 %1959  ;;  %v2151_v50 = vsel %vm2150_vm14, %v2149_v10, %v2147_v41 }
 0x425   :  { %v2059_v61 = vadd.f32 %v2041_v12, %v1960_v23 }
 0x427   :  { %v2079_v44 = vadd.f32 %v4211_v11, %v2059_v61 }
 0x429   :  { %v2153_v5 = vperm.slane %v2079_v44, %v2152_v0 }
 0x42b   :  { %v2155_v57 = vsel %vm2154_vm15, %v2153_v5, %v2151_v50 }
 0x42c   :  { %v2044_v34 = vpop.xlane.xlu0 %2043 }
 0x42d   :  { %v2060_v32 = vadd.f32 %v2044_v34, %v1963_v43 }
 0x42f   :  { %v2080_v37 = vadd.f32 %v4211_v11, %v2060_v32 }
 0x431   :  { %v2157_v1 = vperm.slane %v2080_v37, %v2156_v22 }
 0x433   :  { %v2159_v62 = vsel %vm2158_vm0, %v2157_v1, %v2155_v57 }
 0x434   :  { %2161 = vst [vmem:[#allocation5] sm:$0x1] %v2159_v62 }
 0x435   :  { %2172 = dma.vmem_to_hbm [thread:$0]  %s2168_s14, 16, %s2170_s17, [#allocation3]  }
 0x436   :  { %2512 = dma.done.wait [#allocation3], 16  }
 0x437   :  { %2513 = vsyncadd [#allocation3], 4294967280 }
 0x438   :  { %2177 = vsyncpa [#allocation3], 1 }
 0x439   :  { %2178 = vsyncpa [#allocation4], 1 }

</bundles_post_ra>
